<compile_context>
chip_gen: v5e
topology: v5e:2x2
jax: 0.10.0
libtpu: 0.0.40
codegen_flags: <defaults>
</compile_context>

<pallas_src>
import functools

import jax
import jax.numpy as jnp
from jax import lax
from jax.experimental import pallas as pl
from jax.experimental.pallas import tpu as pltpu

# ---- module hyper-parameters (update_step etc. are globals in the source) ----
D_IN, H1, H2, C = 3, 120, 84, 88            # DaNN(n_input=3, 120, 84, n_class=88)
D_PAD, H1P, H2P, CP = 128, 128, 128, 128    # lane-dense padded sizes
BASE_LR = 1 * 0.01
UPDATE_STEP = 3


# ----------------------------- fused Pallas kernel ----------------------------
def _meta_task_kernel(xs_ref, ys_ref, xq_ref,
                      w1_ref, b1_ref, w2_ref, b2_ref, w3_ref, b3_ref,
                      out_ref):
    xs = xs_ref[0]                    # (N_SPT, 128)  support inputs (padded)
    ys = ys_ref[0]                    # (N_SPT, 128)  one-hot labels (padded cold)
    xq = xq_ref[0]                    # (N_QRY, 128)  query inputs (padded)
    inv_n = 1.0 / xs.shape[0]

    # -1e30 on padded class lanes so softmax/grads equal the 88-class problem.
    lane = lax.broadcasted_iota(jnp.int32, (1, CP), 1)
    cls_mask = jnp.where(lane < C, 0.0, -1e30).astype(jnp.float32)

    def forward(x, p):
        w1, b1, w2, b2, w3, b3 = p
        z1 = jnp.dot(x, w1, preferred_element_type=jnp.float32) + b1
        h1 = jnp.maximum(z1, 0.0)
        z2 = jnp.dot(h1, w2, preferred_element_type=jnp.float32) + b2
        h2 = jnp.maximum(z2, 0.0)
        logits = jnp.dot(h2, w3, preferred_element_type=jnp.float32) + b3
        return z1, h1, z2, h2, logits

    def sgd_step(_, p):
        w1, b1, w2, b2, w3, b3 = p
        z1, h1, z2, h2, logits = forward(xs, p)

        # stable softmax on masked logits (mean cross-entropy backward)
        lg = logits + cls_mask
        m = jnp.max(lg, axis=-1, keepdims=True)
        e = jnp.exp(lg - m)
        s = jnp.sum(e, axis=-1, keepdims=True)
        prob = e * pl.reciprocal(s, approx=True)

        dlogits = (prob - ys) * inv_n
        dw3 = lax.dot_general(h2, dlogits, (((0,), (0,)), ((), ())),
                              preferred_element_type=jnp.float32)
        db3 = jnp.sum(dlogits, axis=0, keepdims=True)
        dh2 = lax.dot_general(dlogits, w3, (((1,), (1,)), ((), ())),
                              preferred_element_type=jnp.float32)
        dz2 = dh2 * (z2 > 0.0).astype(jnp.float32)
        dw2 = lax.dot_general(h1, dz2, (((0,), (0,)), ((), ())),
                              preferred_element_type=jnp.float32)
        db2 = jnp.sum(dz2, axis=0, keepdims=True)
        dh1 = lax.dot_general(dz2, w2, (((1,), (1,)), ((), ())),
                              preferred_element_type=jnp.float32)
        dz1 = dh1 * (z1 > 0.0).astype(jnp.float32)
        dw1 = lax.dot_general(xs, dz1, (((0,), (0,)), ((), ())),
                              preferred_element_type=jnp.float32)
        db1 = jnp.sum(dz1, axis=0, keepdims=True)

        return (w1 - BASE_LR * dw1, b1 - BASE_LR * db1,
                w2 - BASE_LR * dw2, b2 - BASE_LR * db2,
                w3 - BASE_LR * dw3, b3 - BASE_LR * db3)

    params = (w1_ref[...], b1_ref[...], w2_ref[...], b2_ref[...],
              w3_ref[...], b3_ref[...])
    fast = lax.fori_loop(0, UPDATE_STEP, sgd_step, params, unroll=True)

    # query logits of this task under its final fast weights
    out_ref[0] = forward(xq, fast)[-1]


# ---------------------------------- wrappers -----------------------------------
def _pad_last(x, target):
    pad = target - x.shape[-1]
    if pad == 0:
        return x
    return jnp.concatenate(
        [x, jnp.zeros(x.shape[:-1] + (pad,), x.dtype)], axis=-1)


@functools.partial(jax.jit, static_argnames=("task_num",))
def _fused_meta_forward(x_spt, y_spt, x_qry, params, task_num):
    xs = _pad_last(x_spt[:task_num].astype(jnp.float32), D_PAD)
    xq = _pad_last(x_qry[:task_num].astype(jnp.float32), D_PAD)
    ys = jax.nn.one_hot(y_spt[:task_num], CP, dtype=jnp.float32)
    w1, b1, w2, b2, w3, b3 = params
    n_spt, n_qry = xs.shape[1], xq.shape[1]

    out = pl.pallas_call(
        _meta_task_kernel,
        out_shape=jax.ShapeDtypeStruct((task_num, n_qry, CP), jnp.float32),
        grid=(task_num,),
        in_specs=[
            pl.BlockSpec((1, n_spt, D_PAD), lambda i: (i, 0, 0)),
            pl.BlockSpec((1, n_spt, CP), lambda i: (i, 0, 0)),
            pl.BlockSpec((1, n_qry, D_PAD), lambda i: (i, 0, 0)),
            pl.BlockSpec((D_PAD, H1P), lambda i: (0, 0)),
            pl.BlockSpec((1, H1P), lambda i: (0, 0)),
            pl.BlockSpec((H1P, H2P), lambda i: (0, 0)),
            pl.BlockSpec((1, H2P), lambda i: (0, 0)),
            pl.BlockSpec((H2P, CP), lambda i: (0, 0)),
            pl.BlockSpec((1, CP), lambda i: (0, 0)),
        ],
        out_specs=pl.BlockSpec((1, n_qry, CP), lambda i: (i, 0, 0)),
        compiler_params=pltpu.CompilerParams(
            dimension_semantics=("parallel",)),
    )(xs, ys, xq, w1, b1, w2, b2, w3, b3)

    # The PyTorch forward returns y_hat1: query logits of the LAST task.
    return out[task_num - 1, :, :C]


def meta_learner_forward(x_spt, y_spt, x_qry, y_qry, params, train=1):
    """Reproduces the tensor returned by MetaLearner.forward (y_hat1)."""
    # TODO(synk): meta Adam step (self.net mutation) not reproduced — it does
    # not affect the returned tensor.
    del y_qry  # only feeds dead query-loss bookkeeping in the original
    if train == 1:
        task_num = 5
    else:
        task_num = int(x_spt.shape[0])
    return _fused_meta_forward(x_spt, y_spt, x_qry, tuple(params),
                               task_num=task_num)


# ------------------------------ pure-JAX reference ------------------------------
def _ref_fwd(x, p):
    w1, b1, w2, b2, w3, b3 = p
    h1 = jnp.maximum(x @ w1 + b1, 0.0)
    h2 = jnp.maximum(h1 @ w2 + b2, 0.0)
    return h2 @ w3 + b3


def _ref_loss(p, x, y_oh):
    logits = _ref_fwd(x, p)
    return -jnp.mean(jnp.sum(y_oh * jax.nn.log_softmax(logits, -1), -1))


def _ref_meta_forward(x_spt, y_spt, x_qry, params, task_num):
    y_hat1 = None
    for i in range(task_num):
        xs, xq = x_spt[i], x_qry[i]
        ys_oh = jax.nn.one_hot(y_spt[i], C, dtype=jnp.float32)
        fast = list(params)
        for _ in range(UPDATE_STEP):
            grads = jax.grad(_ref_loss)(fast, xs, ys_oh)
            fast = [p - BASE_LR * g for p, g in zip(fast, grads)]
        y_hat1 = _ref_fwd(xq, fast)
    return y_hat1


# ------------------------------------ main --------------------------------------
if __name__ == "__main__":
    key = jax.random.PRNGKey(0)
    kw1, kw2, kw3, kx_spt, kx_qry, ky_spt, ky_qry = jax.random.split(key, 7)

    # torch Linear-style weights, stored [in, out] (kernel computes x @ W + b)
    w1u = 0.1 * jax.random.normal(kw1, (D_IN, H1), jnp.float32)
    b1u = jnp.zeros((1, H1), jnp.float32)
    w2u = 0.1 * jax.random.normal(kw2, (H1, H2), jnp.float32)
    b2u = jnp.zeros((1, H2), jnp.float32)
    w3u = 0.1 * jax.random.normal(kw3, (H2, C), jnp.float32)
    b3u = jnp.zeros((1, C), jnp.float32)

    def _pad2(a, shape):
        out = jnp.zeros(shape, a.dtype)
        return out.at[:a.shape[0], :a.shape[1]].set(a)

    params_pad = (
        _pad2(w1u, (D_PAD, H1P)), _pad2(b1u, (1, H1P)),
        _pad2(w2u, (H1P, H2P)), _pad2(b2u, (1, H2P)),
        _pad2(w3u, (H2P, CP)), _pad2(b3u, (1, CP)),
    )

    # inputs: task_num=5 (train==1), 8 support / 8 query samples, 3 features
    TASKS, N_SPT, N_QRY = 5, 8, 8
    x_spt = jax.random.normal(kx_spt, (TASKS, N_SPT, D_IN), jnp.float32)
    x_qry = jax.random.normal(kx_qry, (TASKS, N_QRY, D_IN), jnp.float32)
    y_spt = jax.random.randint(ky_spt, (TASKS, N_SPT), 0, C, jnp.int32)
    y_qry = jax.random.randint(ky_qry, (TASKS, N_QRY), 0, C, jnp.int32)

    y_hat1 = meta_learner_forward(x_spt, y_spt, x_qry, y_qry, params_pad, train=1)
    y_hat1 = jax.block_until_ready(y_hat1)

    y_ref = _ref_meta_forward(x_spt, y_spt, x_qry,
                              [w1u, b1u, w2u, b2u, w3u, b3u], TASKS)
    assert y_hat1.shape == (N_QRY, C)
    assert jnp.allclose(y_hat1, y_ref, rtol=1e-4, atol=1e-4), "mismatch vs JAX ref"

    print("KERNEL_OK")
</pallas_src>

<mosaic_0001>
module attributes {stable_mosaic.version = 11 : i64} {
  func.func @_meta_task_kernel(%arg0: i32, %arg1: memref<1x8x128xf32, #tpu.memory_space<vmem>>, %arg2: memref<1x8x128xf32, #tpu.memory_space<vmem>>, %arg3: memref<1x8x128xf32, #tpu.memory_space<vmem>>, %arg4: memref<128x128xf32, #tpu.memory_space<vmem>>, %arg5: memref<1x128xf32, #tpu.memory_space<vmem>>, %arg6: memref<128x128xf32, #tpu.memory_space<vmem>>, %arg7: memref<1x128xf32, #tpu.memory_space<vmem>>, %arg8: memref<128x128xf32, #tpu.memory_space<vmem>>, %arg9: memref<1x128xf32, #tpu.memory_space<vmem>>, %arg10: memref<1x8x128xf32, #tpu.memory_space<vmem>>) attributes {dimension_semantics = [#tpu.dimension_semantics<parallel>], iteration_bounds = array<i64: 5>, scalar_prefetch = 0 : i64, scratch_operands = 0 : i64, tpu.core_type = #tpu.core_type<tc>, window_params = [{transform_indices = @transform_0, window_bounds = array<i64: 1, 8, 128>}, {transform_indices = @transform_1, window_bounds = array<i64: 1, 8, 128>}, {transform_indices = @transform_2, window_bounds = array<i64: 1, 8, 128>}, {pipeline_mode = #tpu.pipeline_mode<synchronous>, transform_indices = @transform_3, window_bounds = array<i64: 128, 128>}, {pipeline_mode = #tpu.pipeline_mode<synchronous>, transform_indices = @transform_4, window_bounds = array<i64: 1, 128>}, {pipeline_mode = #tpu.pipeline_mode<synchronous>, transform_indices = @transform_5, window_bounds = array<i64: 128, 128>}, {pipeline_mode = #tpu.pipeline_mode<synchronous>, transform_indices = @transform_6, window_bounds = array<i64: 1, 128>}, {pipeline_mode = #tpu.pipeline_mode<synchronous>, transform_indices = @transform_7, window_bounds = array<i64: 128, 128>}, {pipeline_mode = #tpu.pipeline_mode<synchronous>, transform_indices = @transform_8, window_bounds = array<i64: 1, 128>}, {transform_indices = @transform_9, window_bounds = array<i64: 1, 8, 128>}]} {
    %c0 = arith.constant 0 : index
    %c0_0 = arith.constant 0 : index
    %c0_1 = arith.constant 0 : index
    %0 = vector.load %arg1[%c0, %c0_0, %c0_1] : memref<1x8x128xf32, #tpu.memory_space<vmem>>, vector<1x8x128xf32>
    %1 = vector.shape_cast %0 : vector<1x8x128xf32> to vector<8x128xf32>
    %c0_2 = arith.constant 0 : index
    %c0_3 = arith.constant 0 : index
    %c0_4 = arith.constant 0 : index
    %2 = vector.load %arg2[%c0_2, %c0_3, %c0_4] : memref<1x8x128xf32, #tpu.memory_space<vmem>>, vector<1x8x128xf32>
    %3 = vector.shape_cast %2 : vector<1x8x128xf32> to vector<8x128xf32>
    %c0_5 = arith.constant 0 : index
    %c0_6 = arith.constant 0 : index
    %c0_7 = arith.constant 0 : index
    %4 = vector.load %arg3[%c0_5, %c0_6, %c0_7] : memref<1x8x128xf32, #tpu.memory_space<vmem>>, vector<1x8x128xf32>
    %5 = vector.shape_cast %4 : vector<1x8x128xf32> to vector<8x128xf32>
    %6 = tpu.iota {dimensions = array<i32: 1>} : vector<1x128xi32>
    %c88_i32 = arith.constant 88 : i32
    %7 = vector.broadcast %c88_i32 : i32 to vector<1x128xi32>
    %8 = arith.cmpi slt, %6, %7 : vector<1x128xi32>
    %cst = arith.constant 0.000000e+00 : f32
    %cst_8 = arith.constant -1.000000e+30 : f32
    %9 = vector.broadcast %cst : f32 to vector<1x128xf32>
    %10 = vector.broadcast %cst_8 : f32 to vector<1x128xf32>
    %11 = arith.select %8, %9, %10 : vector<1x128xi1>, vector<1x128xf32>
    %c0_9 = arith.constant 0 : index
    %c0_10 = arith.constant 0 : index
    %12 = vector.load %arg4[%c0_9, %c0_10] : memref<128x128xf32, #tpu.memory_space<vmem>>, vector<128x128xf32>
    %c0_11 = arith.constant 0 : index
    %c0_12 = arith.constant 0 : index
    %13 = vector.load %arg5[%c0_11, %c0_12] : memref<1x128xf32, #tpu.memory_space<vmem>>, vector<1x128xf32>
    %c0_13 = arith.constant 0 : index
    %c0_14 = arith.constant 0 : index
    %14 = vector.load %arg6[%c0_13, %c0_14] : memref<128x128xf32, #tpu.memory_space<vmem>>, vector<128x128xf32>
    %c0_15 = arith.constant 0 : index
    %c0_16 = arith.constant 0 : index
    %15 = vector.load %arg7[%c0_15, %c0_16] : memref<1x128xf32, #tpu.memory_space<vmem>>, vector<1x128xf32>
    %c0_17 = arith.constant 0 : index
    %c0_18 = arith.constant 0 : index
    %16 = vector.load %arg8[%c0_17, %c0_18] : memref<128x128xf32, #tpu.memory_space<vmem>>, vector<128x128xf32>
    %c0_19 = arith.constant 0 : index
    %c0_20 = arith.constant 0 : index
    %17 = vector.load %arg9[%c0_19, %c0_20] : memref<1x128xf32, #tpu.memory_space<vmem>>, vector<1x128xf32>
    %c0_i32 = arith.constant 0 : i32
    %cst_21 = arith.constant dense<0.000000e+00> : vector<8x128xf32>
    %18 = tpu.matmul %1, %12, %cst_21 {dimension_numbers = #tpu.dot_dimension_numbers<[1], [0], [0], [1], [0, 0, 1, 1], [], []>} : vector<8x128xf32>, vector<128x128xf32>, vector<8x128xf32> -> vector<8x128xf32>
    %19 = vector.broadcast %13 : vector<1x128xf32> to vector<8x128xf32>
    %20 = arith.addf %18, %19 : vector<8x128xf32>
    %cst_22 = arith.constant 0.000000e+00 : f32
    %21 = vector.broadcast %cst_22 : f32 to vector<8x128xf32>
    %22 = arith.maximumf %20, %21 : vector<8x128xf32>
    %cst_23 = arith.constant dense<0.000000e+00> : vector<8x128xf32>
    %23 = tpu.matmul %22, %14, %cst_23 {dimension_numbers = #tpu.dot_dimension_numbers<[1], [0], [0], [1], [0, 0, 1, 1], [], []>} : vector<8x128xf32>, vector<128x128xf32>, vector<8x128xf32> -> vector<8x128xf32>
    %24 = vector.broadcast %15 : vector<1x128xf32> to vector<8x128xf32>
    %25 = arith.addf %23, %24 : vector<8x128xf32>
    %cst_24 = arith.constant 0.000000e+00 : f32
    %26 = vector.broadcast %cst_24 : f32 to vector<8x128xf32>
    %27 = arith.maximumf %25, %26 : vector<8x128xf32>
    %cst_25 = arith.constant dense<0.000000e+00> : vector<8x128xf32>
    %28 = tpu.matmul %27, %16, %cst_25 {dimension_numbers = #tpu.dot_dimension_numbers<[1], [0], [0], [1], [0, 0, 1, 1], [], []>} : vector<8x128xf32>, vector<128x128xf32>, vector<8x128xf32> -> vector<8x128xf32>
    %29 = vector.broadcast %17 : vector<1x128xf32> to vector<8x128xf32>
    %30 = arith.addf %28, %29 : vector<8x128xf32>
    %31 = vector.broadcast %11 : vector<1x128xf32> to vector<8x128xf32>
    %32 = arith.addf %30, %31 : vector<8x128xf32>
    %cst_26 = arith.constant dense<0xFF800000> : vector<8xf32>
    %33 = vector.multi_reduction <maximumf>, %32, %cst_26 [1] : vector<8x128xf32> to vector<8xf32>
    %34 = vector.shape_cast %33 : vector<8xf32> to vector<8x1xf32>
    %35 = vector.broadcast %34 : vector<8x1xf32> to vector<8x128xf32>
    %36 = arith.subf %32, %35 : vector<8x128xf32>
    %37 = math.exp %36 : vector<8x128xf32>
    %cst_27 = arith.constant dense<0.000000e+00> : vector<8xf32>
    %38 = vector.multi_reduction <add>, %37, %cst_27 [1] : vector<8x128xf32> to vector<8xf32>
    %39 = vector.shape_cast %38 : vector<8xf32> to vector<8x1xf32>
    %40 = tpu.reciprocal %39 {approx = true} : vector<8x1xf32> -> vector<8x1xf32>
    %41 = vector.broadcast %40 : vector<8x1xf32> to vector<8x128xf32>
    %42 = arith.mulf %37, %41 : vector<8x128xf32>
    %43 = arith.subf %42, %3 : vector<8x128xf32>
    %cst_28 = arith.constant 1.250000e-01 : f32
    %44 = vector.broadcast %cst_28 : f32 to vector<8x128xf32>
    %45 = arith.mulf %43, %44 : vector<8x128xf32>
    %cst_29 = arith.constant dense<0.000000e+00> : vector<128x128xf32>
    %46 = tpu.matmul %27, %45, %cst_29 {dimension_numbers = #tpu.dot_dimension_numbers<[0], [0], [1], [1], [0, 1, 1, 1], [], []>} : vector<8x128xf32>, vector<8x128xf32>, vector<128x128xf32> -> vector<128x128xf32>
    %cst_30 = arith.constant dense<0.000000e+00> : vector<128xf32>
    %47 = vector.multi_reduction <add>, %45, %cst_30 [0] : vector<8x128xf32> to vector<128xf32>
    %48 = vector.shape_cast %47 : vector<128xf32> to vector<1x128xf32>
    %cst_31 = arith.constant dense<0.000000e+00> : vector<8x128xf32>
    %49 = tpu.matmul %45, %16, %cst_31 {dimension_numbers = #tpu.dot_dimension_numbers<[1], [1], [0], [0], [0, 0, 1, 0], [], []>} : vector<8x128xf32>, vector<128x128xf32>, vector<8x128xf32> -> vector<8x128xf32>
    %cst_32 = arith.constant 0.000000e+00 : f32
    %50 = vector.broadcast %cst_32 : f32 to vector<8x128xf32>
    %51 = arith.cmpf ogt, %25, %50 : vector<8x128xf32>
    %52 = arith.extui %51 : vector<8x128xi1> to vector<8x128xi32>
    %53 = arith.sitofp %52 : vector<8x128xi32> to vector<8x128xf32>
    %54 = arith.mulf %49, %53 : vector<8x128xf32>
    %cst_33 = arith.constant dense<0.000000e+00> : vector<128x128xf32>
    %55 = tpu.matmul %22, %54, %cst_33 {dimension_numbers = #tpu.dot_dimension_numbers<[0], [0], [1], [1], [0, 1, 1, 1], [], []>} : vector<8x128xf32>, vector<8x128xf32>, vector<128x128xf32> -> vector<128x128xf32>
    %cst_34 = arith.constant dense<0.000000e+00> : vector<128xf32>
    %56 = vector.multi_reduction <add>, %54, %cst_34 [0] : vector<8x128xf32> to vector<128xf32>
    %57 = vector.shape_cast %56 : vector<128xf32> to vector<1x128xf32>
    %cst_35 = arith.constant dense<0.000000e+00> : vector<8x128xf32>
    %58 = tpu.matmul %54, %14, %cst_35 {dimension_numbers = #tpu.dot_dimension_numbers<[1], [1], [0], [0], [0, 0, 1, 0], [], []>} : vector<8x128xf32>, vector<128x128xf32>, vector<8x128xf32> -> vector<8x128xf32>
    %cst_36 = arith.constant 0.000000e+00 : f32
    %59 = vector.broadcast %cst_36 : f32 to vector<8x128xf32>
    %60 = arith.cmpf ogt, %20, %59 : vector<8x128xf32>
    %61 = arith.extui %60 : vector<8x128xi1> to vector<8x128xi32>
    %62 = arith.sitofp %61 : vector<8x128xi32> to vector<8x128xf32>
    %63 = arith.mulf %58, %62 : vector<8x128xf32>
    %cst_37 = arith.constant dense<0.000000e+00> : vector<128x128xf32>
    %64 = tpu.matmul %1, %63, %cst_37 {dimension_numbers = #tpu.dot_dimension_numbers<[0], [0], [1], [1], [0, 1, 1, 1], [], []>} : vector<8x128xf32>, vector<8x128xf32>, vector<128x128xf32> -> vector<128x128xf32>
    %cst_38 = arith.constant dense<0.000000e+00> : vector<128xf32>
    %65 = vector.multi_reduction <add>, %63, %cst_38 [0] : vector<8x128xf32> to vector<128xf32>
    %66 = vector.shape_cast %65 : vector<128xf32> to vector<1x128xf32>
    %cst_39 = arith.constant 0.00999999977 : f32
    %67 = vector.broadcast %cst_39 : f32 to vector<128x128xf32>
    %68 = arith.mulf %67, %64 : vector<128x128xf32>
    %69 = arith.subf %12, %68 : vector<128x128xf32>
    %cst_40 = arith.constant 0.00999999977 : f32
    %70 = vector.broadcast %cst_40 : f32 to vector<1x128xf32>
    %71 = arith.mulf %70, %66 : vector<1x128xf32>
    %72 = arith.subf %13, %71 : vector<1x128xf32>
    %cst_41 = arith.constant 0.00999999977 : f32
    %73 = vector.broadcast %cst_41 : f32 to vector<128x128xf32>
    %74 = arith.mulf %73, %55 : vector<128x128xf32>
    %75 = arith.subf %14, %74 : vector<128x128xf32>
    %cst_42 = arith.constant 0.00999999977 : f32
    %76 = vector.broadcast %cst_42 : f32 to vector<1x128xf32>
    %77 = arith.mulf %76, %57 : vector<1x128xf32>
    %78 = arith.subf %15, %77 : vector<1x128xf32>
    %cst_43 = arith.constant 0.00999999977 : f32
    %79 = vector.broadcast %cst_43 : f32 to vector<128x128xf32>
    %80 = arith.mulf %79, %46 : vector<128x128xf32>
    %81 = arith.subf %16, %80 : vector<128x128xf32>
    %cst_44 = arith.constant 0.00999999977 : f32
    %82 = vector.broadcast %cst_44 : f32 to vector<1x128xf32>
    %83 = arith.mulf %82, %48 : vector<1x128xf32>
    %84 = arith.subf %17, %83 : vector<1x128xf32>
    %c1_i32 = arith.constant 1 : i32
    %cst_45 = arith.constant dense<0.000000e+00> : vector<8x128xf32>
    %85 = tpu.matmul %1, %69, %cst_45 {dimension_numbers = #tpu.dot_dimension_numbers<[1], [0], [0], [1], [0, 0, 1, 1], [], []>} : vector<8x128xf32>, vector<128x128xf32>, vector<8x128xf32> -> vector<8x128xf32>
    %86 = vector.broadcast %72 : vector<1x128xf32> to vector<8x128xf32>
    %87 = arith.addf %85, %86 : vector<8x128xf32>
    %cst_46 = arith.constant 0.000000e+00 : f32
    %88 = vector.broadcast %cst_46 : f32 to vector<8x128xf32>
    %89 = arith.maximumf %87, %88 : vector<8x128xf32>
    %cst_47 = arith.constant dense<0.000000e+00> : vector<8x128xf32>
    %90 = tpu.matmul %89, %75, %cst_47 {dimension_numbers = #tpu.dot_dimension_numbers<[1], [0], [0], [1], [0, 0, 1, 1], [], []>} : vector<8x128xf32>, vector<128x128xf32>, vector<8x128xf32> -> vector<8x128xf32>
    %91 = vector.broadcast %78 : vector<1x128xf32> to vector<8x128xf32>
    %92 = arith.addf %90, %91 : vector<8x128xf32>
    %cst_48 = arith.constant 0.000000e+00 : f32
    %93 = vector.broadcast %cst_48 : f32 to vector<8x128xf32>
    %94 = arith.maximumf %92, %93 : vector<8x128xf32>
    %cst_49 = arith.constant dense<0.000000e+00> : vector<8x128xf32>
    %95 = tpu.matmul %94, %81, %cst_49 {dimension_numbers = #tpu.dot_dimension_numbers<[1], [0], [0], [1], [0, 0, 1, 1], [], []>} : vector<8x128xf32>, vector<128x128xf32>, vector<8x128xf32> -> vector<8x128xf32>
    %96 = vector.broadcast %84 : vector<1x128xf32> to vector<8x128xf32>
    %97 = arith.addf %95, %96 : vector<8x128xf32>
    %98 = vector.broadcast %11 : vector<1x128xf32> to vector<8x128xf32>
    %99 = arith.addf %97, %98 : vector<8x128xf32>
    %cst_50 = arith.constant dense<0xFF800000> : vector<8xf32>
    %100 = vector.multi_reduction <maximumf>, %99, %cst_50 [1] : vector<8x128xf32> to vector<8xf32>
    %101 = vector.shape_cast %100 : vector<8xf32> to vector<8x1xf32>
    %102 = vector.broadcast %101 : vector<8x1xf32> to vector<8x128xf32>
    %103 = arith.subf %99, %102 : vector<8x128xf32>
    %104 = math.exp %103 : vector<8x128xf32>
    %cst_51 = arith.constant dense<0.000000e+00> : vector<8xf32>
    %105 = vector.multi_reduction <add>, %104, %cst_51 [1] : vector<8x128xf32> to vector<8xf32>
    %106 = vector.shape_cast %105 : vector<8xf32> to vector<8x1xf32>
    %107 = tpu.reciprocal %106 {approx = true} : vector<8x1xf32> -> vector<8x1xf32>
    %108 = vector.broadcast %107 : vector<8x1xf32> to vector<8x128xf32>
    %109 = arith.mulf %104, %108 : vector<8x128xf32>
    %110 = arith.subf %109, %3 : vector<8x128xf32>
    %cst_52 = arith.constant 1.250000e-01 : f32
    %111 = vector.broadcast %cst_52 : f32 to vector<8x128xf32>
    %112 = arith.mulf %110, %111 : vector<8x128xf32>
    %cst_53 = arith.constant dense<0.000000e+00> : vector<128x128xf32>
    %113 = tpu.matmul %94, %112, %cst_53 {dimension_numbers = #tpu.dot_dimension_numbers<[0], [0], [1], [1], [0, 1, 1, 1], [], []>} : vector<8x128xf32>, vector<8x128xf32>, vector<128x128xf32> -> vector<128x128xf32>
    %cst_54 = arith.constant dense<0.000000e+00> : vector<128xf32>
    %114 = vector.multi_reduction <add>, %112, %cst_54 [0] : vector<8x128xf32> to vector<128xf32>
    %115 = vector.shape_cast %114 : vector<128xf32> to vector<1x128xf32>
    %cst_55 = arith.constant dense<0.000000e+00> : vector<8x128xf32>
    %116 = tpu.matmul %112, %81, %cst_55 {dimension_numbers = #tpu.dot_dimension_numbers<[1], [1], [0], [0], [0, 0, 1, 0], [], []>} : vector<8x128xf32>, vector<128x128xf32>, vector<8x128xf32> -> vector<8x128xf32>
    %cst_56 = arith.constant 0.000000e+00 : f32
    %117 = vector.broadcast %cst_56 : f32 to vector<8x128xf32>
    %118 = arith.cmpf ogt, %92, %117 : vector<8x128xf32>
    %119 = arith.extui %118 : vector<8x128xi1> to vector<8x128xi32>
    %120 = arith.sitofp %119 : vector<8x128xi32> to vector<8x128xf32>
    %121 = arith.mulf %116, %120 : vector<8x128xf32>
    %cst_57 = arith.constant dense<0.000000e+00> : vector<128x128xf32>
    %122 = tpu.matmul %89, %121, %cst_57 {dimension_numbers = #tpu.dot_dimension_numbers<[0], [0], [1], [1], [0, 1, 1, 1], [], []>} : vector<8x128xf32>, vector<8x128xf32>, vector<128x128xf32> -> vector<128x128xf32>
    %cst_58 = arith.constant dense<0.000000e+00> : vector<128xf32>
    %123 = vector.multi_reduction <add>, %121, %cst_58 [0] : vector<8x128xf32> to vector<128xf32>
    %124 = vector.shape_cast %123 : vector<128xf32> to vector<1x128xf32>
    %cst_59 = arith.constant dense<0.000000e+00> : vector<8x128xf32>
    %125 = tpu.matmul %121, %75, %cst_59 {dimension_numbers = #tpu.dot_dimension_numbers<[1], [1], [0], [0], [0, 0, 1, 0], [], []>} : vector<8x128xf32>, vector<128x128xf32>, vector<8x128xf32> -> vector<8x128xf32>
    %cst_60 = arith.constant 0.000000e+00 : f32
    %126 = vector.broadcast %cst_60 : f32 to vector<8x128xf32>
    %127 = arith.cmpf ogt, %87, %126 : vector<8x128xf32>
    %128 = arith.extui %127 : vector<8x128xi1> to vector<8x128xi32>
    %129 = arith.sitofp %128 : vector<8x128xi32> to vector<8x128xf32>
    %130 = arith.mulf %125, %129 : vector<8x128xf32>
    %cst_61 = arith.constant dense<0.000000e+00> : vector<128x128xf32>
    %131 = tpu.matmul %1, %130, %cst_61 {dimension_numbers = #tpu.dot_dimension_numbers<[0], [0], [1], [1], [0, 1, 1, 1], [], []>} : vector<8x128xf32>, vector<8x128xf32>, vector<128x128xf32> -> vector<128x128xf32>
    %cst_62 = arith.constant dense<0.000000e+00> : vector<128xf32>
    %132 = vector.multi_reduction <add>, %130, %cst_62 [0] : vector<8x128xf32> to vector<128xf32>
    %133 = vector.shape_cast %132 : vector<128xf32> to vector<1x128xf32>
    %cst_63 = arith.constant 0.00999999977 : f32
    %134 = vector.broadcast %cst_63 : f32 to vector<128x128xf32>
    %135 = arith.mulf %134, %131 : vector<128x128xf32>
    %136 = arith.subf %69, %135 : vector<128x128xf32>
    %cst_64 = arith.constant 0.00999999977 : f32
    %137 = vector.broadcast %cst_64 : f32 to vector<1x128xf32>
    %138 = arith.mulf %137, %133 : vector<1x128xf32>
    %139 = arith.subf %72, %138 : vector<1x128xf32>
    %cst_65 = arith.constant 0.00999999977 : f32
    %140 = vector.broadcast %cst_65 : f32 to vector<128x128xf32>
    %141 = arith.mulf %140, %122 : vector<128x128xf32>
    %142 = arith.subf %75, %141 : vector<128x128xf32>
    %cst_66 = arith.constant 0.00999999977 : f32
    %143 = vector.broadcast %cst_66 : f32 to vector<1x128xf32>
    %144 = arith.mulf %143, %124 : vector<1x128xf32>
    %145 = arith.subf %78, %144 : vector<1x128xf32>
    %cst_67 = arith.constant 0.00999999977 : f32
    %146 = vector.broadcast %cst_67 : f32 to vector<128x128xf32>
    %147 = arith.mulf %146, %113 : vector<128x128xf32>
    %148 = arith.subf %81, %147 : vector<128x128xf32>
    %cst_68 = arith.constant 0.00999999977 : f32
    %149 = vector.broadcast %cst_68 : f32 to vector<1x128xf32>
    %150 = arith.mulf %149, %115 : vector<1x128xf32>
    %151 = arith.subf %84, %150 : vector<1x128xf32>
    %c2_i32 = arith.constant 2 : i32
    %cst_69 = arith.constant dense<0.000000e+00> : vector<8x128xf32>
    %152 = tpu.matmul %1, %136, %cst_69 {dimension_numbers = #tpu.dot_dimension_numbers<[1], [0], [0], [1], [0, 0, 1, 1], [], []>} : vector<8x128xf32>, vector<128x128xf32>, vector<8x128xf32> -> vector<8x128xf32>
    %153 = vector.broadcast %139 : vector<1x128xf32> to vector<8x128xf32>
    %154 = arith.addf %152, %153 : vector<8x128xf32>
    %cst_70 = arith.constant 0.000000e+00 : f32
    %155 = vector.broadcast %cst_70 : f32 to vector<8x128xf32>
    %156 = arith.maximumf %154, %155 : vector<8x128xf32>
    %cst_71 = arith.constant dense<0.000000e+00> : vector<8x128xf32>
    %157 = tpu.matmul %156, %142, %cst_71 {dimension_numbers = #tpu.dot_dimension_numbers<[1], [0], [0], [1], [0, 0, 1, 1], [], []>} : vector<8x128xf32>, vector<128x128xf32>, vector<8x128xf32> -> vector<8x128xf32>
    %158 = vector.broadcast %145 : vector<1x128xf32> to vector<8x128xf32>
    %159 = arith.addf %157, %158 : vector<8x128xf32>
    %cst_72 = arith.constant 0.000000e+00 : f32
    %160 = vector.broadcast %cst_72 : f32 to vector<8x128xf32>
    %161 = arith.maximumf %159, %160 : vector<8x128xf32>
    %cst_73 = arith.constant dense<0.000000e+00> : vector<8x128xf32>
    %162 = tpu.matmul %161, %148, %cst_73 {dimension_numbers = #tpu.dot_dimension_numbers<[1], [0], [0], [1], [0, 0, 1, 1], [], []>} : vector<8x128xf32>, vector<128x128xf32>, vector<8x128xf32> -> vector<8x128xf32>
    %163 = vector.broadcast %151 : vector<1x128xf32> to vector<8x128xf32>
    %164 = arith.addf %162, %163 : vector<8x128xf32>
    %165 = vector.broadcast %11 : vector<1x128xf32> to vector<8x128xf32>
    %166 = arith.addf %164, %165 : vector<8x128xf32>
    %cst_74 = arith.constant dense<0xFF800000> : vector<8xf32>
    %167 = vector.multi_reduction <maximumf>, %166, %cst_74 [1] : vector<8x128xf32> to vector<8xf32>
    %168 = vector.shape_cast %167 : vector<8xf32> to vector<8x1xf32>
    %169 = vector.broadcast %168 : vector<8x1xf32> to vector<8x128xf32>
    %170 = arith.subf %166, %169 : vector<8x128xf32>
    %171 = math.exp %170 : vector<8x128xf32>
    %cst_75 = arith.constant dense<0.000000e+00> : vector<8xf32>
    %172 = vector.multi_reduction <add>, %171, %cst_75 [1] : vector<8x128xf32> to vector<8xf32>
    %173 = vector.shape_cast %172 : vector<8xf32> to vector<8x1xf32>
    %174 = tpu.reciprocal %173 {approx = true} : vector<8x1xf32> -> vector<8x1xf32>
    %175 = vector.broadcast %174 : vector<8x1xf32> to vector<8x128xf32>
    %176 = arith.mulf %171, %175 : vector<8x128xf32>
    %177 = arith.subf %176, %3 : vector<8x128xf32>
    %cst_76 = arith.constant 1.250000e-01 : f32
    %178 = vector.broadcast %cst_76 : f32 to vector<8x128xf32>
    %179 = arith.mulf %177, %178 : vector<8x128xf32>
    %cst_77 = arith.constant dense<0.000000e+00> : vector<128x128xf32>
    %180 = tpu.matmul %161, %179, %cst_77 {dimension_numbers = #tpu.dot_dimension_numbers<[0], [0], [1], [1], [0, 1, 1, 1], [], []>} : vector<8x128xf32>, vector<8x128xf32>, vector<128x128xf32> -> vector<128x128xf32>
    %cst_78 = arith.constant dense<0.000000e+00> : vector<128xf32>
    %181 = vector.multi_reduction <add>, %179, %cst_78 [0] : vector<8x128xf32> to vector<128xf32>
    %182 = vector.shape_cast %181 : vector<128xf32> to vector<1x128xf32>
    %cst_79 = arith.constant dense<0.000000e+00> : vector<8x128xf32>
    %183 = tpu.matmul %179, %148, %cst_79 {dimension_numbers = #tpu.dot_dimension_numbers<[1], [1], [0], [0], [0, 0, 1, 0], [], []>} : vector<8x128xf32>, vector<128x128xf32>, vector<8x128xf32> -> vector<8x128xf32>
    %cst_80 = arith.constant 0.000000e+00 : f32
    %184 = vector.broadcast %cst_80 : f32 to vector<8x128xf32>
    %185 = arith.cmpf ogt, %159, %184 : vector<8x128xf32>
    %186 = arith.extui %185 : vector<8x128xi1> to vector<8x128xi32>
    %187 = arith.sitofp %186 : vector<8x128xi32> to vector<8x128xf32>
    %188 = arith.mulf %183, %187 : vector<8x128xf32>
    %cst_81 = arith.constant dense<0.000000e+00> : vector<128x128xf32>
    %189 = tpu.matmul %156, %188, %cst_81 {dimension_numbers = #tpu.dot_dimension_numbers<[0], [0], [1], [1], [0, 1, 1, 1], [], []>} : vector<8x128xf32>, vector<8x128xf32>, vector<128x128xf32> -> vector<128x128xf32>
    %cst_82 = arith.constant dense<0.000000e+00> : vector<128xf32>
    %190 = vector.multi_reduction <add>, %188, %cst_82 [0] : vector<8x128xf32> to vector<128xf32>
    %191 = vector.shape_cast %190 : vector<128xf32> to vector<1x128xf32>
    %cst_83 = arith.constant dense<0.000000e+00> : vector<8x128xf32>
    %192 = tpu.matmul %188, %142, %cst_83 {dimension_numbers = #tpu.dot_dimension_numbers<[1], [1], [0], [0], [0, 0, 1, 0], [], []>} : vector<8x128xf32>, vector<128x128xf32>, vector<8x128xf32> -> vector<8x128xf32>
    %cst_84 = arith.constant 0.000000e+00 : f32
    %193 = vector.broadcast %cst_84 : f32 to vector<8x128xf32>
    %194 = arith.cmpf ogt, %154, %193 : vector<8x128xf32>
    %195 = arith.extui %194 : vector<8x128xi1> to vector<8x128xi32>
    %196 = arith.sitofp %195 : vector<8x128xi32> to vector<8x128xf32>
    %197 = arith.mulf %192, %196 : vector<8x128xf32>
    %cst_85 = arith.constant dense<0.000000e+00> : vector<128x128xf32>
    %198 = tpu.matmul %1, %197, %cst_85 {dimension_numbers = #tpu.dot_dimension_numbers<[0], [0], [1], [1], [0, 1, 1, 1], [], []>} : vector<8x128xf32>, vector<8x128xf32>, vector<128x128xf32> -> vector<128x128xf32>
    %cst_86 = arith.constant dense<0.000000e+00> : vector<128xf32>
    %199 = vector.multi_reduction <add>, %197, %cst_86 [0] : vector<8x128xf32> to vector<128xf32>
    %200 = vector.shape_cast %199 : vector<128xf32> to vector<1x128xf32>
    %cst_87 = arith.constant 0.00999999977 : f32
    %201 = vector.broadcast %cst_87 : f32 to vector<128x128xf32>
    %202 = arith.mulf %201, %198 : vector<128x128xf32>
    %203 = arith.subf %136, %202 : vector<128x128xf32>
    %cst_88 = arith.constant 0.00999999977 : f32
    %204 = vector.broadcast %cst_88 : f32 to vector<1x128xf32>
    %205 = arith.mulf %204, %200 : vector<1x128xf32>
    %206 = arith.subf %139, %205 : vector<1x128xf32>
    %cst_89 = arith.constant 0.00999999977 : f32
    %207 = vector.broadcast %cst_89 : f32 to vector<128x128xf32>
    %208 = arith.mulf %207, %189 : vector<128x128xf32>
    %209 = arith.subf %142, %208 : vector<128x128xf32>
    %cst_90 = arith.constant 0.00999999977 : f32
    %210 = vector.broadcast %cst_90 : f32 to vector<1x128xf32>
    %211 = arith.mulf %210, %191 : vector<1x128xf32>
    %212 = arith.subf %145, %211 : vector<1x128xf32>
    %cst_91 = arith.constant 0.00999999977 : f32
    %213 = vector.broadcast %cst_91 : f32 to vector<128x128xf32>
    %214 = arith.mulf %213, %180 : vector<128x128xf32>
    %215 = arith.subf %148, %214 : vector<128x128xf32>
    %cst_92 = arith.constant 0.00999999977 : f32
    %216 = vector.broadcast %cst_92 : f32 to vector<1x128xf32>
    %217 = arith.mulf %216, %182 : vector<1x128xf32>
    %218 = arith.subf %151, %217 : vector<1x128xf32>
    %cst_93 = arith.constant dense<0.000000e+00> : vector<8x128xf32>
    %219 = tpu.matmul %5, %203, %cst_93 {dimension_numbers = #tpu.dot_dimension_numbers<[1], [0], [0], [1], [0, 0, 1, 1], [], []>} : vector<8x128xf32>, vector<128x128xf32>, vector<8x128xf32> -> vector<8x128xf32>
    %220 = vector.broadcast %206 : vector<1x128xf32> to vector<8x128xf32>
    %221 = arith.addf %219, %220 : vector<8x128xf32>
    %cst_94 = arith.constant 0.000000e+00 : f32
    %222 = vector.broadcast %cst_94 : f32 to vector<8x128xf32>
    %223 = arith.maximumf %221, %222 : vector<8x128xf32>
    %cst_95 = arith.constant dense<0.000000e+00> : vector<8x128xf32>
    %224 = tpu.matmul %223, %209, %cst_95 {dimension_numbers = #tpu.dot_dimension_numbers<[1], [0], [0], [1], [0, 0, 1, 1], [], []>} : vector<8x128xf32>, vector<128x128xf32>, vector<8x128xf32> -> vector<8x128xf32>
    %225 = vector.broadcast %212 : vector<1x128xf32> to vector<8x128xf32>
    %226 = arith.addf %224, %225 : vector<8x128xf32>
    %cst_96 = arith.constant 0.000000e+00 : f32
    %227 = vector.broadcast %cst_96 : f32 to vector<8x128xf32>
    %228 = arith.maximumf %226, %227 : vector<8x128xf32>
    %cst_97 = arith.constant dense<0.000000e+00> : vector<8x128xf32>
    %229 = tpu.matmul %228, %215, %cst_97 {dimension_numbers = #tpu.dot_dimension_numbers<[1], [0], [0], [1], [0, 0, 1, 1], [], []>} : vector<8x128xf32>, vector<128x128xf32>, vector<8x128xf32> -> vector<8x128xf32>
    %230 = vector.broadcast %218 : vector<1x128xf32> to vector<8x128xf32>
    %231 = arith.addf %229, %230 : vector<8x128xf32>
    %c0_98 = arith.constant 0 : index
    %c0_99 = arith.constant 0 : index
    %c0_100 = arith.constant 0 : index
    %232 = vector.load %arg10[%c0_98, %c0_99, %c0_100] : memref<1x8x128xf32, #tpu.memory_space<vmem>>, vector<1x8x128xf32>
    %233 = vector.shape_cast %232 : vector<1x8x128xf32> to vector<8x128xf32>
    %234 = vector.shape_cast %231 : vector<8x128xf32> to vector<1x8x128xf32>
    tpu.vector_store %arg10[%c0_98, %c0_99, %c0_100], %234 {strides = array<i32>} : memref<1x8x128xf32, #tpu.memory_space<vmem>>, vector<1x8x128xf32>,
    return
  }
  func.func @transform_0(%arg0: i32) -> (i32, i32, i32) {
    %c0_i32 = arith.constant 0 : i32
    %c0_i32_0 = arith.constant 0 : i32
    %c0_i32_1 = arith.constant 0 : i32
    return %arg0, %c0_i32, %c0_i32_0 : i32, i32, i32
  }
  func.func @transform_1(%arg0: i32) -> (i32, i32, i32) {
    %c0_i32 = arith.constant 0 : i32
    %c0_i32_0 = arith.constant 0 : i32
    %c0_i32_1 = arith.constant 0 : i32
    return %arg0, %c0_i32, %c0_i32_0 : i32, i32, i32
  }
  func.func @transform_2(%arg0: i32) -> (i32, i32, i32) {
    %c0_i32 = arith.constant 0 : i32
    %c0_i32_0 = arith.constant 0 : i32
    %c0_i32_1 = arith.constant 0 : i32
    return %arg0, %c0_i32, %c0_i32_0 : i32, i32, i32
  }
  func.func @transform_3(%arg0: i32) -> (i32, i32) {
    %c0_i32 = arith.constant 0 : i32
    %c0_i32_0 = arith.constant 0 : i32
    %c0_i32_1 = arith.constant 0 : i32
    return %c0_i32, %c0_i32_0 : i32, i32
  }
  func.func @transform_4(%arg0: i32) -> (i32, i32) {
    %c0_i32 = arith.constant 0 : i32
    %c0_i32_0 = arith.constant 0 : i32
    %c0_i32_1 = arith.constant 0 : i32
    return %c0_i32, %c0_i32_0 : i32, i32
  }
  func.func @transform_5(%arg0: i32) -> (i32, i32) {
    %c0_i32 = arith.constant 0 : i32
    %c0_i32_0 = arith.constant 0 : i32
    %c0_i32_1 = arith.constant 0 : i32
    return %c0_i32, %c0_i32_0 : i32, i32
  }
  func.func @transform_6(%arg0: i32) -> (i32, i32) {
    %c0_i32 = arith.constant 0 : i32
    %c0_i32_0 = arith.constant 0 : i32
    %c0_i32_1 = arith.constant 0 : i32
    return %c0_i32, %c0_i32_0 : i32, i32
  }
  func.func @transform_7(%arg0: i32) -> (i32, i32) {
    %c0_i32 = arith.constant 0 : i32
    %c0_i32_0 = arith.constant 0 : i32
    %c0_i32_1 = arith.constant 0 : i32
    return %c0_i32, %c0_i32_0 : i32, i32
  }
  func.func @transform_8(%arg0: i32) -> (i32, i32) {
    %c0_i32 = arith.constant 0 : i32
    %c0_i32_0 = arith.constant 0 : i32
    %c0_i32_1 = arith.constant 0 : i32
    return %c0_i32, %c0_i32_0 : i32, i32
  }
  func.func @transform_9(%arg0: i32) -> (i32, i32, i32) {
    %c0_i32 = arith.constant 0 : i32
    %c0_i32_0 = arith.constant 0 : i32
    %c0_i32_1 = arith.constant 0 : i32
    return %arg0, %c0_i32, %c0_i32_0 : i32, i32, i32
  }
}

</mosaic_0001>

<bundles_post_ra>
// kernel: _fused_meta_forward.1
= control target key start
LH: loop header
LB: loop body
LE: loop exit
PB: predicated region body
PF: predicated region fallthrough
CT: control target
= control target key end

     0   :  { %14 = vsyncpa [#allocation3], 0  ;;  %s2799_s30 = smov 0   ;;  %s4187_s0 = inlined_call_operand.vmem [shape: f32[5,8,128], index: 0, kind: input, shape index: {}]   ;;  %s4188_s1 = inlined_call_operand.vmem [shape: f32[5,8,128], index: 1, kind: input, shape index: {}]   ;;  %s4189_s2 = inlined_call_operand.vmem [shape: f32[5,8,128], index: 2, kind: input, shape index: {}]   ;;  %s4190_s3 = inlined_call_operand.vmem [shape: f32[128,128], index: 3, kind: input, shape index: {}]   ;;  %s4191_s4 = inlined_call_operand.vmem [shape: f32[1,128], index: 4, kind: input, shape index: {}]   ;;  %s4192_s5 = inlined_call_operand.vmem [shape: f32[128,128], index: 5, kind: input, shape index: {}]   ;;  %s4193_s6 = inlined_call_operand.vmem [shape: f32[1,128], index: 6, kind: input, shape index: {}]   ;;  %s4194_s7 = inlined_call_operand.hbm [shape: f32[128,128], index: 7, kind: input, shape index: {}]   ;;  %s4195_s8 = inlined_call_operand.vmem [shape: f32[1,128], index: 8, kind: input, shape index: {}]   ;;  %s4196_s9 = inlined_call_operand.vmem [shape: f32[5,8,128], index: 9, kind: output, shape index: {}]  }
   0x1 LB: > { %s278_s12 = sshll.u32 %s4194_s7, 4  ;;  %s2497_s13 = sadd.s32 4294967295, %s2742_s30   ;;  %s2742_s30 = sphi %s2799_s30, %s20_s30   ;;  %s279_s12 = int_to_ptr.hbm [resolvable:$true] %s278_s12 }
   0x2   : > { %p2499_p0 = scmp.ge.s32.totalorder %s2742_s30, 1  ;;  %p255_p1 = scmp.lt.s32.totalorder %s2742_s30, 6 }
   0x3   : > { %p2670_p2 = scmp.eq.s32.totalorder %s2497_s13, 0  ;;  %s2744_s14 = smov [#allocation2]  }
   0x4   : > { %p256_p3 = pnand %p2499_p0, %p255_p1  ;;  %s280_s15 = sshll.u32 %s2744_s14, 4  ;;  %s281_s15 = int_to_ptr.vmem [resolvable:$true] %s280_s15 }
   0x5   : > { %s2745_s16 = smov 128   ;;  %s2746_s17 = smov 8  }
   0x6   : > { %p2666_p4 = pneg %p256_p3  ;;  %320 = sbr.rel (%p256_p3) target bundleno = 4035 (0xfc3), region = 56 }
   0x8   : > { %p2667_p5 = pnand %p2670_p2, %p2666_p4 }
   0xa   : > { %2669 = dma.hbm_to_vmem [thread:$0]  (!%p2667_p5), %s279_s12, 2048, %s281_s15, [#allocation3], %s2745_s16, %s2745_s16, %s2746_s17  }
   0xb   : > { %2737 = dma.done.wait (%p2670_p2), [#allocation3], 2048  }
   0xc   : > { %2739 = vsyncadd (%p2670_p2), [#allocation3], 4294965248  ;;  %p363_p6 = scmp.lt.s32.totalorder %s2497_s13, 4  ;;  %v2815_v0 = vld [vmem:[%s4190_s3 + $0x78] sm:$0xff]  ;;  %v2820_v1 = vld [vmem:[%s4190_s3 + $0x70] sm:$0xff]  ;;  %v382_v57 = vlaneseq  ;;  %vm552_vm2 = vcmask 64512  }
   0xd   : > { %440 = vmatpush.msra.mxu0 %v2815_v0  ;;  %v2826_v2 = vld [vmem:[%s4190_s3 + $0x68] sm:$0xff]  ;;  %v2838_v3 = vld [vmem:[%s4190_s3 + $0x60] sm:$0xff]  ;;  %v2847_v5 = vld [vmem:[%s4192_s5 + $0x78] sm:$0xff]  ;;  %v2747_v61 = vmov -1e+30  }
   0xe   : > { %s4514_s13 = smov (!%p363_p6, %s2497_s13), 4  ;;  %v2852_v6 = vld [vmem:[%s4190_s3 + $0x58] sm:$0xff]  ;;  %464 = vmatpush.msra.mxu1 %v2847_v5  ;;  %v2859_v7 = vld [vmem:[%s4192_s5 + $0x70] sm:$0xff]  ;;  %v2865_v8 = vld [vmem:[%s4192_s5 + $0x68] sm:$0xff]  ;;  %v383_v58 = vand.u32 127, %v382_v57 }
   0xf   : > { %s2810_s18 = sshll.u32 %s4514_s13, 3  ;;  %441 = vmatpush.msra.mxu0 %v2820_v1  ;;  %v2870_v9 = vld [vmem:[%s4190_s3 + $0x50] sm:$0xff]  ;;  %v2877_v10 = vld [vmem:[%s4192_s5 + $0x60] sm:$0xff]  ;;  %v2882_v11 = vld [vmem:[%s4190_s3 + $0x48] sm:$0xff] }
  0x10   : > { %s2832_s27 = scalar_lea.vmem %s4187_s0, %s2810_s18  ;;  %465 = vmatpush.msra.mxu1 %v2859_v7  ;;  %v2889_v12 = vld [vmem:[%s4192_s5 + $0x58] sm:$0xff]  ;;  %v2894_v13 = vld [vmem:[%s4190_s3 + $0x40] sm:$0xff]  ;;  %v2901_v14 = vld [vmem:[%s4192_s5 + $0x50] sm:$0xff]  ;;  %vm384_vm0 = vcmp.lt.s32.totalorder %v383_v58, 88  ;;  %s3122_s21 = scalar_lea.vmem %s4188_s1, %s2810_s18 }
  0x11   : > { %442 = vmatpush.msra.mxu0 %v2826_v2  ;;  %v2842_v4 = vld [vmem:[%s2832_s27] sm:$0xff]  ;;  %v2906_v15 = vld [vmem:[%s4190_s3 + $0x38] sm:$0xff]  ;;  %v2913_v16 = vld [vmem:[%s4192_s5 + $0x48] sm:$0xff]  ;;  %v3107_v62 = vsel %vm384_vm0, 0.0, %v2747_v61  ;;  %s374_s10 = scalar_lea.vmem %s4189_s2, %s2810_s18  ;;  %s378_s13 = scalar_lea.vmem %s4196_s9, %s2810_s18 }
  0x12   : > { %871 = vxpose.xlu1.b32.start.end [1/1] (short) %v2842_v4, 128  ;;  %466 = vmatpush.msra.mxu1 %v2865_v8  ;;  %v2918_v17 = vld [vmem:[%s4190_s3 + $0x30] sm:$0xff]  ;;  %v2925_v18 = vld [vmem:[%s4192_s5 + $0x40] sm:$0xff]  ;;  %v2930_v19 = vld [vmem:[%s4190_s3 + $0x28] sm:$0xff]  ;;  %4320 = vst [vmem:[#allocation18_spill] sm:$0xff] %v3107_v62 }
  0x13   : > { %443 = vmatpush.msra.mxu0 %v2838_v3  ;;  %v2937_v20 = vld [vmem:[%s4192_s5 + $0x38] sm:$0xff]  ;;  %v2942_v21 = vld [vmem:[%s4190_s3 + $0x20] sm:$0xff]  ;;  %v2949_v22 = vld [vmem:[%s4192_s5 + $0x30] sm:$0xff] }
  0x14   : > { %467 = vmatpush.msra.mxu1 %v2877_v10  ;;  %v2954_v23 = vld [vmem:[%s4190_s3 + $0x18] sm:$0xff]  ;;  %v2961_v24 = vld [vmem:[%s4192_s5 + $0x28] sm:$0xff]  ;;  %v2966_v25 = vld [vmem:[%s4190_s3 + $0x10] sm:$0xff] }
  0x15   : > { %444 = vmatpush.msra.mxu0 %v2852_v6  ;;  %v2973_v26 = vld [vmem:[%s4192_s5 + $0x20] sm:$0xff]  ;;  %v2978_v27 = vld [vmem:[%s4190_s3 + $0x8] sm:$0xff]  ;;  %v2985_v28 = vld [vmem:[%s4192_s5 + $0x18] sm:$0xff] }
  0x16   : > { %468 = vmatpush.msra.mxu1 %v2889_v12  ;;  %v2990_v29 = vld [vmem:[%s4190_s3] sm:$0xff]  ;;  %v3000_v30 = vld [vmem:[%s4192_s5 + $0x10] sm:$0xff]  ;;  %v3006_v31 = vld [vmem:[%s4192_s5 + $0x8] sm:$0xff] }
  0x17   : > { %445 = vmatpush.msra.mxu0 %v2870_v9  ;;  %v3011_v32 = vld [vmem:[%s4192_s5] sm:$0xff]  ;;  %v3015_v33 = vld [vmem:[#allocation2 + $0x78] sm:$0xff]  ;;  %v3017_v34 = vld [vmem:[#allocation2 + $0x70] sm:$0xff] }
  0x18   : > { %469 = vmatpush.msra.mxu1 %v2901_v14  ;;  %488 = vmatpush.msra.mxu2 %v3015_v33  ;;  %v3021_v35 = vld [vmem:[#allocation2 + $0x68] sm:$0xff]  ;;  %v3024_v36 = vld [vmem:[#allocation2 + $0x60] sm:$0xff]  ;;  %v3028_v37 = vld [vmem:[#allocation2 + $0x58] sm:$0xff] }
  0x19   : > { %446 = vmatpush.msra.mxu0 %v2882_v11  ;;  %4307 = vst [vmem:[#allocation5_spill] sm:$0xff] %v3024_v36  ;;  %v3031_v38 = vld [vmem:[#allocation2 + $0x50] sm:$0xff]  ;;  %v3035_v39 = vld [vmem:[#allocation2 + $0x48] sm:$0xff]  ;;  %v3038_v40 = vld [vmem:[#allocation2 + $0x40] sm:$0xff] }
  0x1a   : > { %470 = vmatpush.msra.mxu1 %v2913_v16  ;;  %489 = vmatpush.msra.mxu2 %v3017_v34  ;;  %4308 = vst [vmem:[#allocation6_spill] sm:$0xff] %v3028_v37  ;;  %v3042_v41 = vld [vmem:[#allocation2 + $0x38] sm:$0xff]  ;;  %v3045_v42 = vld [vmem:[#allocation2 + $0x30] sm:$0xff]  ;;  %v3049_v43 = vld [vmem:[#allocation2 + $0x28] sm:$0xff] }
  0x1b   : > { %447 = vmatpush.msra.mxu0 %v2894_v13  ;;  %4309 = vst [vmem:[#allocation7_spill] sm:$0xff] %v3031_v38  ;;  %v3052_v44 = vld [vmem:[#allocation2 + $0x20] sm:$0xff]  ;;  %v3056_v45 = vld [vmem:[#allocation2 + $0x18] sm:$0xff]  ;;  %v3073_v50 = vld [vmem:[#allocation2 + $0x10] sm:$0xff] }
  0x1c   : > { %471 = vmatpush.msra.mxu1 %v2925_v18  ;;  %490 = vmatpush.msra.mxu2 %v3021_v35  ;;  %4310 = vst [vmem:[#allocation8_spill] sm:$0xff] %v3035_v39  ;;  %v2685_v46 = vld [vmem:[%s4191_s4] ss:$0 sm:$0xff]  ;;  %v3077_v51 = vld [vmem:[#allocation2 + $0x8] sm:$0xff] }
  0x1d   : > { %448 = vmatpush.msra.mxu0 %v2906_v15  ;;  %4311 = vst [vmem:[#allocation9_spill] sm:$0xff] %v3038_v40  ;;  %v3079_v52 = vld [vmem:[#allocation2] sm:$0xff] }
  0x1e   : > { %472 = vmatpush.msra.mxu1 %v2937_v20  ;;  %491 = vmatpush.msra.mxu2 %v3024_v36  ;;  %4312 = vst [vmem:[#allocation10_spill] sm:$0xff] %v3042_v41  ;;  %v2686_v53 = vld [vmem:[%s4193_s6] ss:$0 sm:$0xff] }
  0x1f   : > { %449 = vmatpush.msra.mxu0 %v2918_v17  ;;  %4313 = vst [vmem:[#allocation11_spill] sm:$0xff] %v3045_v42  ;;  %v2687_v59 = vld [vmem:[%s4195_s8] ss:$0 sm:$0xff] }
  0x20   : > { %473 = vmatpush.msra.mxu1 %v2949_v22  ;;  %492 = vmatpush.msra.mxu2 %v3028_v37  ;;  %4314 = vst [vmem:[#allocation12_spill] sm:$0xff] %v3049_v43 }
  0x21   : > { %450 = vmatpush.msra.mxu0 %v2930_v19  ;;  %4315 = vst [vmem:[#allocation13_spill] sm:$0xff] %v3052_v44 }
  0x22   : > { %474 = vmatpush.msra.mxu1 %v2961_v24  ;;  %493 = vmatpush.msra.mxu2 %v3031_v38  ;;  %4316 = vst [vmem:[#allocation14_spill] sm:$0xff] %v3056_v45 }
  0x23   : > { %451 = vmatpush.msra.mxu0 %v2942_v21  ;;  %4317 = vst [vmem:[#allocation15_spill] sm:$0xff] %v3073_v50 }
  0x24   : > { %475 = vmatpush.msra.mxu1 %v2973_v26  ;;  %494 = vmatpush.msra.mxu2 %v3035_v39  ;;  %4318 = vst [vmem:[#allocation16_spill] sm:$0xff] %v3077_v51 }
  0x25   : > { %452 = vmatpush.msra.mxu0 %v2954_v23  ;;  %4319 = vst [vmem:[#allocation17_spill] sm:$0xff] %v3079_v52 }
  0x26   : > { %476 = vmatpush.msra.mxu1 %v2985_v28  ;;  %495 = vmatpush.msra.mxu2 %v3038_v40 }
  0x27   : > { %453 = vmatpush.msra.mxu0 %v2966_v25 }
  0x28   : > { %477 = vmatpush.msra.mxu1 %v3000_v30  ;;  %496 = vmatpush.msra.mxu2 %v3042_v41 }
  0x29   : > { %454 = vmatpush.msra.mxu0 %v2978_v27 }
  0x2a   : > { %478 = vmatpush.msra.mxu1 %v3006_v31  ;;  %497 = vmatpush.msra.mxu2 %v3045_v42 }
  0x2b   : > { %455 = vmatpush.msra.mxu0 %v2990_v29 }
  0x2c   : > { %456 = vmatmul.f32.vlgmr.msra.gmra.mxu0 %v2842_v4  ;;  %479 = vmatpush.msra.mxu1 %v3011_v32 }
  0x2d   : > { %672 = vmatpush.xpose.msrb.mxu0 %v3015_v33  ;;  %498 = vmatpush.msra.mxu2 %v3049_v43 }
  0x2f   : > { %499 = vmatpush.msra.mxu2 %v3052_v44 }
  0x31   : > { %673 = vmatpush.xpose.msrb.mxu0 %v3017_v34  ;;  %500 = vmatpush.msra.mxu2 %v3056_v45 }
  0x33   : > { %501 = vmatpush.msra.mxu2 %v3073_v50 }
  0x35   : > { %674 = vmatpush.xpose.msrb.mxu0 %v3021_v35  ;;  %502 = vmatpush.msra.mxu2 %v3077_v51 }
  0x37   : > { %503 = vmatpush.msra.mxu2 %v3079_v52 }
  0x39   : > { %675 = vmatpush.xpose.msrb.mxu0 %v3024_v36  ;;  %847 = vmatpush.xpose.msrb.mxu2 %v2847_v5 }
  0x3d   : > { %676 = vmatpush.xpose.msrb.mxu0 %v3028_v37  ;;  %848 = vmatpush.xpose.msrb.mxu2 %v2859_v7 }
  0x41   : > { %677 = vmatpush.xpose.msrb.mxu0 %v3031_v38  ;;  %849 = vmatpush.xpose.msrb.mxu2 %v2865_v8 }
  0x45   : > { %678 = vmatpush.xpose.msrb.mxu0 %v3035_v39  ;;  %850 = vmatpush.xpose.msrb.mxu2 %v2877_v10 }
  0x49   : > { %679 = vmatpush.xpose.msrb.mxu0 %v3038_v40  ;;  %851 = vmatpush.xpose.msrb.mxu2 %v2889_v12 }
  0x4d   : > { %680 = vmatpush.xpose.msrb.mxu0 %v3042_v41  ;;  %852 = vmatpush.xpose.msrb.mxu2 %v2901_v14  ;;  %v4215_v41 = vmov 0.0  }
  0x51   : > { %681 = vmatpush.xpose.msrb.mxu0 %v3045_v42  ;;  %853 = vmatpush.xpose.msrb.mxu2 %v2913_v16 }
  0x55   : > { %682 = vmatpush.xpose.msrb.mxu0 %v3049_v43  ;;  %854 = vmatpush.xpose.msrb.mxu2 %v2925_v18 }
  0x59   : > { %683 = vmatpush.xpose.msrb.mxu0 %v3052_v44  ;;  %855 = vmatpush.xpose.msrb.mxu2 %v2937_v20 }
  0x5d   : > { %684 = vmatpush.xpose.msrb.mxu0 %v3056_v45  ;;  %856 = vmatpush.xpose.msrb.mxu2 %v2949_v22 }
  0x61   : > { %685 = vmatpush.xpose.msrb.mxu0 %v3073_v50  ;;  %857 = vmatpush.xpose.msrb.mxu2 %v2961_v24 }
  0x65   : > { %686 = vmatpush.xpose.msrb.mxu0 %v3077_v51  ;;  %858 = vmatpush.xpose.msrb.mxu2 %v2973_v26 }
  0x69   : > { %687 = vmatpush.xpose.msrb.mxu0 %v3079_v52  ;;  %859 = vmatpush.xpose.msrb.mxu2 %v2985_v28 }
  0x6d   : > { %860 = vmatpush.xpose.msrb.mxu2 %v3000_v30 }
  0x71   : > { %861 = vmatpush.xpose.msrb.mxu2 %v3006_v31 }
  0x75   : > { %862 = vmatpush.xpose.msrb.mxu2 %v3011_v32 }
  0xa9   : > { %v457_v47 = vpop.f32.mrf.mxu0 }
  0xaa   : > { %v3064_v48 = vadd.f32 %v2685_v46, %v457_v47 }
  0xac   : > { %v460_v49 = vmax.f32 %v3064_v48, 0.0  ;;  %vm867_vm3 = vcmp.gt.f32.partialorder %v3064_v48, 0.0 }
  0xae   : > { %696 = vxpose.xlu1.b32.start.end [1/1] (short) %v460_v49, 128  ;;  %480 = vmatmul.f32.vlgmr.msra.gmra.mxu1 %v460_v49 }
 0x12b   : > { %v481_v54 = vpop.f32.mrf.mxu1 }
 0x12c   : > { %v482_v55 = vadd.f32 %v2686_v53, %v481_v54 }
 0x12e   : > { %v484_v56 = vmax.f32 %v482_v55, 0.0  ;;  %vm692_vm1 = vcmp.gt.f32.partialorder %v482_v55, 0.0 }
 0x12f   : > { %v2524_v40 = vsel %vm692_vm1, 1.0, %v4215_v41 }
 0x130   : > { %520 = vxpose.xlu2.b32.start.end [1/1] (short) %v484_v56, 128  ;;  %504 = vmatmul.f32.vlgmr.msra.gmra.mxu2 %v484_v56  ;;  %v3110_v56 = vpop.trf.xlu1 }
 0x131   : > { %4321 = vst [vmem:[#allocation19_spill] sm:$0xff] %v3110_v56 }
 0x138   : > { %v3112_v57 = vpop.trf.xlu1 }
 0x139   : > { %4322 = vst [vmem:[#allocation20_spill] sm:$0xff] %v3112_v57 }
 0x140   : > { %v3114_v58 = vpop.trf.xlu1 }
 0x141   : > { %4323 = vst [vmem:[#allocation21_spill] sm:$0xff] %v3114_v58 }
 0x148   : > { %v3116_v61 = vpop.trf.xlu1 }
 0x149   : > { %4324 = vst [vmem:[#allocation22_spill] sm:$0xff] %v3116_v61 }
 0x1b3   : > { %v505_v60 = vpop.f32.mrf.mxu2 }
 0x1b4   : > { %v506_v63 = vadd.f32 %v2687_v59, %v505_v60  ;;  %v3125_v60 = vld [vmem:[%s3122_s21] sm:$0xff] }
 0x1b5   : > { %4325 = vst [vmem:[#allocation23_spill] sm:$0xff] %v3125_v60 }
 0x1b6   : > { %v508_v46 = vadd.f32 %v506_v63, %v3107_v62 }
 0x1b8   : > { %509 = vmax.xlane.f32.xlu0 %v508_v46 }
 0x22b   : > { %v510_v47 = vpop.xlane.xlu0 %509 }
 0x22c   : > { %v511_v49 = vsub.f32 %v508_v46, %v510_v47  ;;  %v3127_v46 = vpop.trf.xlu1 }
 0x22d   : > { %4326 = vst [vmem:[#allocation24_spill] sm:$0xff] %v3127_v46 }
 0x22e   : > { %v512_v53 = vmul.f32 1.442695, %v511_v49 }
 0x230   : > { %2688 = vpow2.f32 %v512_v53 }
 0x236   : > { %v2689_v54 = vpop.eup %2688 }
 0x237   : > { %514 = vadd.xlane.f32.xlu0 %v2689_v54 }
 0x2aa   : > { %v515_v51 = vpop.xlane.xlu0 %514 }
 0x2ab   : > { %2690 = vrcp.f32 %v515_v51  ;;  %v3134_v51 = vpop.trf.xlu1 }
 0x2ac   : > { %4328 = vst [vmem:[#allocation26_spill] sm:$0xff] %v3134_v51 }
 0x2b1   : > { %v2691_v59 = vpop.eup %2690 }
 0x2b2   : > { %v517_v63 = vmul.f32 %v2691_v59, %v2689_v54 }
 0x2b3   : > { %v3136_v53 = vpop.trf.xlu1 }
 0x2b4   : > { %v518_v47 = vsub.f32 %v517_v63, %v3125_v60  ;;  %4329 = vst [vmem:[#allocation27_spill] sm:$0xff] %v3136_v53 }
 0x2b6   : > { %v3130_v49 = vmul.f32 0.125, %v518_v47 }
 0x2b8   : > { %4327 = vst [vmem:[#allocation25_spill] sm:$0xff] %v3130_v49  ;;  %616 = vmatpush.msra.mxu3 %v3130_v49  ;;  %688 = vmatmul.f32.vlgmr.msrb.gmra.mxu0 %v3130_v49 }
 0x2bb   : > { %v3138_v62 = vpop.trf.xlu1 }
 0x2bc   : > { %4330 = vst [vmem:[#allocation28_spill] sm:$0xff] %v3138_v62 }
 0x2c3   : > { %v3140_v52 = vpop.trf.xlu1 }
 0x2c4   : > { %4331 = vst [vmem:[#allocation29_spill] sm:$0xff] %v3140_v52 }
 0x2cb   : > { %v3142_v50 = vpop.trf.xlu1 }
 0x2cc   : > { %4332 = vst [vmem:[#allocation30_spill] sm:$0xff] %v3142_v50 }
 0x2d3   : > { %v3144_v54 = vpop.trf.xlu1 }
 0x2d4   : > { %4333 = vst [vmem:[#allocation31_spill] sm:$0xff] %v3144_v54 }
 0x2db   : > { %v3146_v59 = vpop.trf.xlu1 }
 0x2dc   : > { %4334 = vst [vmem:[#allocation32_spill] sm:$0xff] %v3146_v59 }
 0x2e3   : > { %v3148_v63 = vpop.trf.xlu1 }
 0x2e4   : > { %4335 = vst [vmem:[#allocation33_spill] sm:$0xff] %v3148_v63 }
 0x2eb   : > { %v3150_v47 = vpop.trf.xlu1 }
 0x2ec   : > { %4336 = vst [vmem:[#allocation34_spill] sm:$0xff] %v3150_v47 }
 0x2f3   : > { %v3152_v60 = vpop.trf.xlu1 }
 0x2fb   : > { %v3154_v49 = vpop.trf.xlu1 }
 0x303   : > { %v712_v45 = vpop.trf.xlu1 }
 0x30b   : > { %v713_v44 = vpop.trf.xlu1 }
 0x313   : > { %v714_v43 = vpop.trf.xlu1 }
 0x31b   : > { %v715_v38 = vpop.trf.xlu1 }
 0x323   : > { %v716_v37 = vpop.trf.xlu1 }
 0x32b   : > { %v717_v55 = vpop.trf.xlu1 }
 0x333   : > { %v718_v36 = vpop.trf.xlu1 }
 0x335   : > { %v689_v42 = vpop.f32.mrf.mxu0 }
 0x336   : > { %v3157_v39 = vmul.f32 %v2524_v40, %v689_v42 }
 0x338   : > { %791 = vmatpush.msrb.mxu1 %v3157_v39  ;;  %863 = vmatmul.f32.vlgmr.msrb.gmra.mxu2 %v3157_v39 }
 0x339   : > { %2525 = vmatmul.msk.f32.vlgmr.msrb.gmra.mxu1 %vm552_vm2, %v712_v45 }
 0x33b   : > { %v719_v40 = vpop.trf.xlu1 }
 0x341   : > { %2526 = vmatmul.msk.f32.gmra.mxu1 %vm552_vm2, %v713_v44 }
 0x343   : > { %v720_v42 = vpop.trf.xlu1 }
 0x349   : > { %2527 = vmatmul.msk.f32.gmra.mxu1 %vm552_vm2, %v714_v43 }
 0x34b   : > { %v721_v45 = vpop.trf.xlu1 }
 0x351   : > { %2528 = vmatmul.msk.f32.gmra.mxu1 %vm552_vm2, %v715_v38 }
 0x353   : > { %v722_v44 = vpop.trf.xlu1 }
 0x359   : > { %2529 = vmatmul.msk.f32.gmra.mxu1 %vm552_vm2, %v716_v37 }
 0x35b   : > { %v723_v43 = vpop.trf.xlu1 }
 0x361   : > { %2530 = vmatmul.msk.f32.gmra.mxu1 %vm552_vm2, %v717_v55 }
 0x363   : > { %v724_v38 = vpop.trf.xlu1 }
 0x369   : > { %2531 = vmatmul.msk.f32.gmra.mxu1 %vm552_vm2, %v718_v36 }
 0x36b   : > { %v725_v37 = vpop.trf.xlu1 }
 0x371   : > { %2532 = vmatmul.msk.f32.gmra.mxu1 %vm552_vm2, %v719_v40 }
 0x373   : > { %v726_v36 = vpop.trf.xlu1 }
 0x379   : > { %2533 = vmatmul.msk.f32.gmra.mxu1 %vm552_vm2, %v720_v42 }
 0x37b   : > { %v727_v55 = vpop.trf.xlu1 }
 0x381   : > { %2534 = vmatmul.msk.f32.gmra.mxu1 %vm552_vm2, %v721_v45  ;;  %v2541_v45 = vsel %vm867_vm3, 1.0, %v4215_v41 }
 0x389   : > { %2535 = vmatmul.msk.f32.gmra.mxu1 %vm552_vm2, %v722_v44 }
 0x391   : > { %2536 = vmatmul.msk.f32.gmra.mxu1 %vm552_vm2, %v723_v43 }
 0x399   : > { %2537 = vmatmul.msk.f32.gmra.mxu1 %vm552_vm2, %v724_v38 }
 0x3a1   : > { %2538 = vmatmul.msk.f32.gmra.mxu1 %vm552_vm2, %v725_v37 }
 0x3a9   : > { %2539 = vmatmul.msk.f32.gmra.mxu1 %vm552_vm2, %v726_v36 }
 0x3b1   : > { %2540 = vmatmul.msk.f32.gmra.mxu1 %vm552_vm2, %v727_v55 }
 0x3b6   : > { %v3177_v40 = vpop.f32.mrf.mxu1 }
 0x3bb   : > { %v864_v42 = vpop.f32.mrf.mxu2 }
 0x3bc   : > { %v3181_v44 = vmul.f32 %v2541_v45, %v864_v42  ;;  %v536_v45 = vpop.trf.xlu2 }
 0x3bd   : > { %2508 = vmatmul.msk.f32.vlgmr.msra.gmra.mxu3 %vm552_vm2, %v536_v45 }
 0x3be   : > { %v3183_v43 = vpop.f32.mrf.mxu1  ;;  %966 = vmatpush.msra.mxu0 %v3181_v44 }
 0x3bf   : > { %2542 = vmatmul.msk.f32.vlgmr.msra.gmra.mxu0 %vm552_vm2, %v3110_v56 }
 0x3c6   : > { %v3188_v38 = vpop.f32.mrf.mxu1 }
 0x3c7   : > { %2543 = vmatmul.msk.f32.gmra.mxu0 %vm552_vm2, %v3112_v57 }
 0x3ce   : > { %v3192_v37 = vpop.f32.mrf.mxu1 }
 0x3cf   : > { %2544 = vmatmul.msk.f32.gmra.mxu0 %vm552_vm2, %v3114_v58 }
 0x3d6   : > { %v3196_v48 = vpop.f32.mrf.mxu1 }
 0x3d7   : > { %2545 = vmatmul.msk.f32.gmra.mxu0 %vm552_vm2, %v3116_v61  ;;  %v537_v61 = vpop.trf.xlu2 }
 0x3d8   : > { %2509 = vmatmul.msk.f32.gmra.mxu3 %vm552_vm2, %v537_v61 }
 0x3de   : > { %v3200_v36 = vpop.f32.mrf.mxu1 }
 0x3df   : > { %2546 = vmatmul.msk.f32.gmra.mxu0 %vm552_vm2, %v3127_v46  ;;  %v538_v58 = vpop.trf.xlu2 }
 0x3e0   : > { %2510 = vmatmul.msk.f32.gmra.mxu3 %vm552_vm2, %v538_v58 }
 0x3e6   : > { %v3204_v55 = vpop.f32.mrf.mxu1 }
 0x3e7   : > { %2547 = vmatmul.msk.f32.gmra.mxu0 %vm552_vm2, %v3134_v51 }
 0x3ee   : > { %v814_v42 = vpop.f32.mrf.mxu1 }
 0x3ef   : > { %2548 = vmatmul.msk.f32.gmra.mxu0 %vm552_vm2, %v3136_v53  ;;  %v539_v53 = vpop.trf.xlu2 }
 0x3f0   : > { %2511 = vmatmul.msk.f32.gmra.mxu3 %vm552_vm2, %v539_v53 }
 0x3f6   : > { %v817_v41 = vpop.f32.mrf.mxu1 }
 0x3f7   : > { %2549 = vmatmul.msk.f32.gmra.mxu0 %vm552_vm2, %v3138_v62  ;;  %v540_v62 = vpop.trf.xlu2 }
 0x3f8   : > { %2512 = vmatmul.msk.f32.gmra.mxu3 %vm552_vm2, %v540_v62 }
 0x3fe   : > { %v820_v46 = vpop.f32.mrf.mxu1 }
 0x3ff   : > { %2550 = vmatmul.msk.f32.gmra.mxu0 %vm552_vm2, %v3140_v52  ;;  %v541_v52 = vpop.trf.xlu2 }
 0x400   : > { %2513 = vmatmul.msk.f32.gmra.mxu3 %vm552_vm2, %v541_v52 }
 0x406   : > { %v823_v51 = vpop.f32.mrf.mxu1 }
 0x407   : > { %2551 = vmatmul.msk.f32.gmra.mxu0 %vm552_vm2, %v3142_v50  ;;  %v542_v50 = vpop.trf.xlu2 }
 0x408   : > { %2514 = vmatmul.msk.f32.gmra.mxu3 %vm552_vm2, %v542_v50 }
 0x40e   : > { %v826_v45 = vpop.f32.mrf.mxu1 }
 0x40f   : > { %2552 = vmatmul.msk.f32.gmra.mxu0 %vm552_vm2, %v3144_v54  ;;  %v543_v54 = vpop.trf.xlu2 }
 0x410   : > { %2515 = vmatmul.msk.f32.gmra.mxu3 %vm552_vm2, %v543_v54  ;;  %v1067_v54 = vmul.f32 0.01, %v826_v45  ;;  %v1059_v45 = vmul.f32 0.01, %v3192_v37  ;;  %v1057_v37 = vmul.f32 0.01, %v3183_v43 }
 0x416   : > { %v829_v61 = vpop.f32.mrf.mxu1 }
 0x417   : > { %2553 = vmatmul.msk.f32.gmra.mxu0 %vm552_vm2, %v3146_v59 }
 0x41e   : > { %v832_v58 = vpop.f32.mrf.mxu1 }
 0x41f   : > { %2554 = vmatmul.msk.f32.gmra.mxu0 %vm552_vm2, %v3148_v63  ;;  %v1069_v52 = vmul.f32 0.01, %v832_v58  ;;  %v1068_v63 = vmul.f32 0.01, %v829_v61  ;;  %v1066_v58 = vmul.f32 0.01, %v823_v51 }
 0x426   : > { %v835_v53 = vpop.f32.mrf.mxu1 }
 0x427   : > { %2555 = vmatmul.msk.f32.gmra.mxu0 %vm552_vm2, %v3150_v47  ;;  %v1070_v57 = vmul.f32 0.01, %v835_v53  ;;  %v544_v47 = vpop.trf.xlu2  ;;  %v3243_v53 = vsub.f32 %v2865_v8, %v1069_v52  ;;  %v1064_v8 = vmul.f32 0.01, %v817_v41  ;;  %v1061_v41 = vmul.f32 0.01, %v3200_v36 }
 0x428   : > { %2516 = vmatmul.msk.f32.gmra.mxu3 %vm552_vm2, %v544_v47 }
 0x429   : > { %v3238_v50 = vsub.f32 %v2859_v7, %v1070_v57  ;;  %v1065_v7 = vmul.f32 0.01, %v820_v46  ;;  %v3255_v57 = vsub.f32 %v2889_v12, %v1067_v54  ;;  %v1062_v12 = vmul.f32 0.01, %v3204_v55 }
 0x42a   : > { %v3291_v36 = vsub.f32 %v2961_v24, %v1061_v41  ;;  %v3304_v24 = vsub.f32 %v2985_v28, %v1059_v45 }
 0x42b   : > { %v3266_v47 = vsub.f32 %v2913_v16, %v1065_v7  ;;  %v1060_v16 = vmul.f32 0.01, %v3196_v48  ;;  %v1056_v48 = vmul.f32 0.01, %v3177_v40  ;;  %v3318_v40 = vsub.f32 %v3006_v31, %v1057_v37 }
 0x42c   : > { %4340 = vst [vmem:[#allocation38_spill] sm:$0xff] %v3291_v36 }
 0x42d   : > { %4342 = vst [vmem:[#allocation40_spill] sm:$0xff] %v3304_v24 }
 0x42e   : > { %v838_v62 = vpop.f32.mrf.mxu1  ;;  %4345 = vst [vmem:[#allocation43_spill] sm:$0xff] %v3318_v40 }
 0x42f   : > { %v1071_v59 = vmul.f32 0.01, %v838_v62  ;;  %2556 = vmatmul.msk.f32.gmra.mxu0 %vm552_vm2, %v3152_v60  ;;  %v545_v51 = vpop.trf.xlu2  ;;  %v3315_v62 = vsub.f32 %v3011_v32, %v1056_v48 }
 0x430   : > { %2517 = vmatmul.msk.f32.gmra.mxu3 %vm552_vm2, %v545_v51 }
 0x431   : > { %v3235_v56 = vsub.f32 %v2847_v5, %v1071_v59  ;;  %v3248_v5 = vsub.f32 %v2877_v10, %v1068_v63  ;;  %v3259_v59 = vsub.f32 %v2901_v14, %v1066_v58  ;;  %v1063_v63 = vmul.f32 0.01, %v814_v42  ;;  %4344 = vst [vmem:[#allocation42_spill] sm:$0xff] %v3315_v62 }
 0x432   : > { %v3272_v14 = vsub.f32 %v2925_v18, %v1064_v8  ;;  %v3283_v42 = vsub.f32 %v2949_v22, %v1062_v12  ;;  %v3297_v22 = vsub.f32 %v2973_v26, %v1060_v16 }
 0x433   : > { %1533 = vmatpush.xpose.msrb.mxu0 %v3235_v56  ;;  %1151 = vmatpush.msrb.mxu3 %v3235_v56  ;;  %v3278_v46 = vsub.f32 %v2937_v20, %v1063_v63  ;;  %v1058_v20 = vmul.f32 0.01, %v3188_v38 }
 0x434   : > { %4337 = vst [vmem:[#allocation35_spill] sm:$0xff] %v3272_v14 }
 0x435   : > { %1152 = vmatpush.msrb.mxu3 %v3238_v50  ;;  %4338 = vst [vmem:[#allocation36_spill] sm:$0xff] %v3278_v46  ;;  %v3308_v61 = vsub.f32 %v3000_v30, %v1058_v20 }
 0x436   : > { %4339 = vst [vmem:[#allocation37_spill] sm:$0xff] %v3283_v42 }
 0x437   : > { %2557 = vmatmul.msk.f32.gmra.mxu0 %vm552_vm2, %v3154_v49  ;;  %1153 = vmatpush.msrb.mxu3 %v3243_v53  ;;  %v546_v55 = vpop.trf.xlu2  ;;  %4341 = vst [vmem:[#allocation39_spill] sm:$0xff] %v3297_v22 }
 0x438   : > { %1534 = vmatpush.xpose.msrb.mxu0 %v3238_v50  ;;  %2518 = vmatmul.msk.f32.gmra.mxu3 %vm552_vm2, %v546_v55  ;;  %4343 = vst [vmem:[#allocation41_spill] sm:$0xff] %v3308_v61 }
 0x439   : > { %1154 = vmatpush.msrb.mxu3 %v3248_v5 }
 0x43b   : > { %1155 = vmatpush.msrb.mxu3 %v3255_v57 }
 0x43c   : > { %1535 = vmatpush.xpose.msrb.mxu0 %v3243_v53  ;;  %v3263_v10 = vpop.f32.mrf.mxu0 }
 0x43d   : > { %1156 = vmatpush.msrb.mxu3 %v3259_v59 }
 0x43f   : > { %1157 = vmatpush.msrb.mxu3 %v3266_v47  ;;  %v547_v38 = vpop.trf.xlu2 }
 0x440   : > { %1536 = vmatpush.xpose.msrb.mxu0 %v3248_v5  ;;  %2519 = vmatmul.msk.f32.gmra.mxu3 %vm552_vm2, %v547_v38  ;;  %v3339_v8 = vpop.f32.mrf.mxu3 }
 0x441   : > { %1158 = vmatpush.msrb.mxu3 %v3272_v14 }
 0x443   : > { %1159 = vmatpush.msrb.mxu3 %v3278_v46 }
 0x444   : > { %1537 = vmatpush.xpose.msrb.mxu0 %v3255_v57  ;;  %v3287_v18 = vpop.f32.mrf.mxu0 }
 0x445   : > { %1160 = vmatpush.msrb.mxu3 %v3283_v42 }
 0x447   : > { %1161 = vmatpush.msrb.mxu3 %v3291_v36  ;;  %v548_v30 = vpop.trf.xlu2 }
 0x448   : > { %1538 = vmatpush.xpose.msrb.mxu0 %v3259_v59  ;;  %2520 = vmatmul.msk.f32.gmra.mxu3 %vm552_vm2, %v548_v30 }
 0x449   : > { %1162 = vmatpush.msrb.mxu3 %v3297_v22 }
 0x44b   : > { %1163 = vmatpush.msrb.mxu3 %v3304_v24 }
 0x44c   : > { %1539 = vmatpush.xpose.msrb.mxu0 %v3266_v47  ;;  %v3312_v26 = vpop.f32.mrf.mxu0 }
 0x44d   : > { %1164 = vmatpush.msrb.mxu3 %v3308_v61 }
 0x44f   : > { %1165 = vmatpush.msrb.mxu3 %v3318_v40  ;;  %v549_v32 = vpop.trf.xlu2 }
 0x450   : > { %1540 = vmatpush.xpose.msrb.mxu0 %v3272_v14  ;;  %2521 = vmatmul.msk.f32.gmra.mxu3 %vm552_vm2, %v549_v32 }
 0x451   : > { %1166 = vmatpush.msrb.mxu3 %v3315_v62 }
 0x454   : > { %1541 = vmatpush.xpose.msrb.mxu0 %v3278_v46  ;;  %v3326_v28 = vpop.f32.mrf.mxu0 }
 0x457   : > { %v550_v52 = vpop.trf.xlu2 }
 0x458   : > { %1542 = vmatpush.xpose.msrb.mxu0 %v3283_v42  ;;  %2522 = vmatmul.msk.f32.gmra.mxu3 %vm552_vm2, %v550_v52 }
 0x45b   : > { %v3341_v63 = vpop.f32.mrf.mxu3 }
 0x45c   : > { %1543 = vmatpush.xpose.msrb.mxu0 %v3291_v36  ;;  %v980_v31 = vpop.f32.mrf.mxu0 }
 0x45f   : > { %v551_v58 = vpop.trf.xlu2 }
 0x460   : > { %1544 = vmatpush.xpose.msrb.mxu0 %v3297_v22  ;;  %2523 = vmatmul.msk.f32.gmra.mxu3 %vm552_vm2, %v551_v58 }
 0x463   : > { %v3343_v41 = vpop.f32.mrf.mxu3 }
 0x464   : > { %1545 = vmatpush.xpose.msrb.mxu0 %v3304_v24  ;;  %v983_v43 = vpop.f32.mrf.mxu0 }
 0x468   : > { %1546 = vmatpush.xpose.msrb.mxu0 %v3308_v61 }
 0x46c   : > { %1547 = vmatpush.xpose.msrb.mxu0 %v3318_v40  ;;  %v986_v54 = vpop.f32.mrf.mxu0 }
 0x470   : > { %1548 = vmatpush.xpose.msrb.mxu0 %v3315_v62 }
 0x473   : > { %v3345_v55 = vpop.f32.mrf.mxu3 }
 0x474   : > { %v989_v7 = vpop.f32.mrf.mxu0 }
 0x47b   : > { %v3347_v20 = vpop.f32.mrf.mxu3 }
 0x47c   : > { %v992_v51 = vpop.f32.mrf.mxu0 }
 0x483   : > { %v3349_v37 = vpop.f32.mrf.mxu3 }
 0x484   : > { %v995_v12 = vpop.f32.mrf.mxu0 }
 0x48b   : > { %v3351_v30 = vpop.f32.mrf.mxu3 }
 0x48c   : > { %v998_v16 = vpop.f32.mrf.mxu0 }
 0x493   : > { %v3353_v52 = vpop.f32.mrf.mxu3 }
 0x494   : > { %v1001_v45 = vpop.f32.mrf.mxu0 }
 0x495   : > { %v1033_v46 = vmul.f32 0.01, %v1001_v45 }
 0x49c   : > { %v1004_v48 = vpop.f32.mrf.mxu0 }
 0x49d   : > { %v1034_v22 = vmul.f32 0.01, %v1004_v48 }
 0x4a4   : > { %v1007_v38 = vpop.f32.mrf.mxu0 }
 0x4a5   : > { %v1035_v61 = vmul.f32 0.01, %v1007_v38  ;;  %v3369_v38 = vsub.f32 %v2838_v3, %v1034_v22  ;;  %v1028_v3 = vmul.f32 0.01, %v986_v54  ;;  %v1025_v54 = vmul.f32 0.01, %v3326_v28 }
 0x4a6   : > { %v1022_v28 = vmul.f32 0.01, %v3263_v10 }
 0x4a7   : > { %v3365_v14 = vsub.f32 %v2826_v2, %v1035_v61  ;;  %v1029_v61 = vmul.f32 0.01, %v989_v7  ;;  %v3393_v7 = vsub.f32 %v2918_v17, %v1028_v3  ;;  %v1023_v17 = vmul.f32 0.01, %v3287_v18 }
 0x4a8   : > { %v3421_v18 = vsub.f32 %v2990_v29, %v1022_v28 }
 0x4aa   : > { %4351 = vst [vmem:[#allocation49_spill] sm:$0xff] %v3421_v18 }
 0x4ab   : > { %v3362_v42 = vpop.f32.mrf.mxu3 }
 0x4ac   : > { %v1010_v32 = vpop.f32.mrf.mxu0 }
 0x4ad   : > { %v1036_v62 = vmul.f32 0.01, %v1010_v32  ;;  %v1032_v32 = vmul.f32 0.01, %v998_v16 }
 0x4af   : > { %v3359_v36 = vsub.f32 %v2820_v1, %v1036_v62  ;;  %v3373_v1 = vsub.f32 %v2852_v6, %v1033_v46  ;;  %v1030_v62 = vmul.f32 0.01, %v992_v51  ;;  %v1027_v6 = vmul.f32 0.01, %v983_v43 }
 0x4b0   : > { %v3389_v46 = vsub.f32 %v2906_v15, %v1029_v61  ;;  %v1024_v43 = vmul.f32 0.01, %v3312_v26 }
 0x4b1   : > { %v3385_v22 = vsub.f32 %v2894_v13, %v1030_v62  ;;  %v3398_v13 = vsub.f32 %v2930_v19, %v1027_v6  ;;  %v4352_v62 = vld [vmem:[#allocation5_spill] sm:$0xff]  ;;  %v1098_v6 = vmul.f32 0.01, %v3362_v42  ;;  %v1095_v42 = vmul.f32 0.01, %v3349_v37 }
 0x4b2   : > { %v3413_v19 = vsub.f32 %v2966_v25, %v1024_v43  ;;  %v1092_v37 = vmul.f32 0.01, %v3343_v41  ;;  %v4363_v41 = vld [vmem:[#allocation17_spill] sm:$0xff] }
 0x4b3   : > { %v645_v2 = vpop.f32.mrf.mxu3  ;;  %4346 = vst [vmem:[#allocation44_spill] sm:$0xff] %v3398_v13 }
 0x4b4   : > { %v1013_v58 = vpop.f32.mrf.mxu0  ;;  %4349 = vst [vmem:[#allocation47_spill] sm:$0xff] %v3413_v19 }
 0x4b5   : > { %v1037_v40 = vmul.f32 0.01, %v1013_v58 }
 0x4b7   : > { %v3356_v24 = vsub.f32 %v2815_v0, %v1037_v40  ;;  %v1031_v0 = vmul.f32 0.01, %v995_v12  ;;  %v3377_v40 = vsub.f32 %v2870_v9, %v1032_v32  ;;  %v1026_v9 = vmul.f32 0.01, %v980_v31 }
 0x4b8   : > { %v3408_v31 = vsub.f32 %v2954_v23, %v1025_v54  ;;  %v4355_v54 = vld [vmem:[#allocation8_spill] sm:$0xff] }
 0x4b9   : > { %1127 = vmatpush.msra.mxu2 %v3356_v24  ;;  %v3381_v16 = vsub.f32 %v2882_v11, %v1031_v0  ;;  %v3403_v15 = vsub.f32 %v2942_v21, %v1026_v9  ;;  %v3417_v21 = vsub.f32 %v2978_v27, %v1023_v17  ;;  %v4356_v17 = vld [vmem:[#allocation9_spill] sm:$0xff] }
 0x4ba   : > { %4348 = vst [vmem:[#allocation46_spill] sm:$0xff] %v3408_v31  ;;  %v3460_v28 = vsub.f32 %v4356_v17, %v1098_v6 }
 0x4bb   : > { %1128 = vmatpush.msra.mxu2 %v3359_v36  ;;  %v648_v11 = vpop.f32.mrf.mxu3  ;;  %4347 = vst [vmem:[#allocation45_spill] sm:$0xff] %v3403_v15 }
 0x4bc   : > { %4350 = vst [vmem:[#allocation48_spill] sm:$0xff] %v3417_v21  ;;  %v1100_v0 = vmul.f32 0.01, %v648_v11  ;;  %v1097_v11 = vmul.f32 0.01, %v3353_v52 }
 0x4bd   : > { %1129 = vmatpush.msra.mxu2 %v3365_v14  ;;  %v1094_v52 = vmul.f32 0.01, %v3347_v20  ;;  %v1090_v20 = vmul.f32 0.01, %v3339_v8  ;;  %v1016_v8 = vrot.slane %v3181_v44, 4 }
 0x4bf   : > { %1130 = vmatpush.msra.mxu2 %v3369_v38 }
 0x4c1   : > { %1131 = vmatpush.msra.mxu2 %v3373_v1 }
 0x4c3   : > { %1132 = vmatpush.msra.mxu2 %v3377_v40  ;;  %v651_v26 = vpop.f32.mrf.mxu3 }
 0x4c4   : > { %v1101_v32 = vmul.f32 0.01, %v651_v26  ;;  %v4357_v26 = vld [vmem:[#allocation10_spill] sm:$0xff] }
 0x4c5   : > { %1133 = vmatpush.msra.mxu2 %v3381_v16 }
 0x4c7   : > { %1134 = vmatpush.msra.mxu2 %v3385_v22 }
 0x4c9   : > { %1135 = vmatpush.msra.mxu2 %v3389_v46 }
 0x4cb   : > { %1136 = vmatpush.msra.mxu2 %v3393_v7  ;;  %v654_v23 = vpop.f32.mrf.mxu3 }
 0x4cc   : > { %v1102_v58 = vmul.f32 0.01, %v654_v23  ;;  %v3466_v23 = vsub.f32 %v4357_v26, %v1097_v11 }
 0x4cd   : > { %1137 = vmatpush.msra.mxu2 %v3398_v13 }
 0x4ce   : > { %v3439_v61 = vsub.f32 %v4352_v62, %v1102_v58  ;;  %v1091_v58 = vmul.f32 0.01, %v3341_v63  ;;  %v1017_v63 = vadd.f32 %v1016_v8, %v3181_v44  ;;  %v841_v44 = vrot.slane %v3157_v39, 4 }
 0x4cf   : > { %1138 = vmatpush.msra.mxu2 %v3403_v15 }
 0x4d1   : > { %1139 = vmatpush.msra.mxu2 %v3408_v31 }
 0x4d3   : > { %1140 = vmatpush.msra.mxu2 %v3413_v19  ;;  %v657_v25 = vpop.f32.mrf.mxu3 }
 0x4d4   : > { %v1103_v48 = vmul.f32 0.01, %v657_v25  ;;  %v4358_v25 = vld [vmem:[#allocation11_spill] sm:$0xff] }
 0x4d5   : > { %1141 = vmatpush.msra.mxu2 %v3417_v21 }
 0x4d7   : > { %1142 = vmatpush.msra.mxu2 %v3421_v18 }
 0x4d8   : > { %1143 = vmatmul.f32.vlgmr.msra.gmra.mxu2 %v2842_v4  ;;  %v3435_v4 = vsub.f32 %v3021_v35, %v1103_v48  ;;  %v4354_v35 = vld [vmem:[#allocation7_spill] sm:$0xff] }
 0x4d9   : > { %v3449_v9 = vsub.f32 %v4354_v35, %v1100_v0  ;;  %v4362_v0 = vld [vmem:[#allocation15_spill] sm:$0xff]  ;;  %v1018_v35 = vrot.slane %v1017_v63, 2 }
 0x4da   : > { %v3493_v62 = vsub.f32 %v4362_v0, %v1092_v37  ;;  %v842_v37 = vadd.f32 %v841_v44, %v3157_v39 }
 0x4db   : > { %v660_v10 = vpop.f32.mrf.mxu3  ;;  %v1019_v11 = vadd.f32 %v1018_v35, %v1017_v63 }
 0x4dc   : > { %v1104_v12 = vmul.f32 0.01, %v660_v10 }
 0x4de   : > { %v3430_v29 = vsub.f32 %v3017_v34, %v1104_v12  ;;  %v4353_v34 = vld [vmem:[#allocation6_spill] sm:$0xff] }
 0x4df   : > { %v3444_v3 = vsub.f32 %v4353_v34, %v1101_v32  ;;  %v4361_v32 = vld [vmem:[#allocation14_spill] sm:$0xff]  ;;  %v4364_v34 = vld [vmem:[#allocation16_spill] sm:$0xff] }
 0x4e0   : > { %v3501_v6 = vsub.f32 %v4364_v34, %v1091_v58 }
 0x4e3   : > { %v663_v51 = vpop.f32.mrf.mxu3 }
 0x4e4   : > { %v1105_v45 = vmul.f32 0.01, %v663_v51  ;;  %v4359_v51 = vld [vmem:[#allocation12_spill] sm:$0xff] }
 0x4e5   : > { %v3477_v12 = vsub.f32 %v4359_v51, %v1095_v42  ;;  %v402_v42 = vld [vmem:[%s4191_s4] sm:$0x1] }
 0x4e6   : > { %v3427_v27 = vsub.f32 %v3015_v33, %v1105_v45  ;;  %v1099_v33 = vmul.f32 0.01, %v645_v2  ;;  %v1096_v2 = vmul.f32 0.01, %v3351_v30  ;;  %v1093_v30 = vmul.f32 0.01, %v3345_v55 }
 0x4e7   : > { %v4360_v45 = vld [vmem:[#allocation13_spill] sm:$0xff] }
 0x4e8   : > { %1358 = vmatpush.xpose.msra.mxu1 %v3427_v27  ;;  %1175 = vmatpush.msrb.mxu2 %v3427_v27  ;;  %v3455_v43 = vsub.f32 %v4355_v54, %v1099_v33  ;;  %v3471_v10 = vsub.f32 %v4358_v25, %v1096_v2  ;;  %v3482_v48 = vsub.f32 %v4360_v45, %v1094_v52  ;;  %v1020_v54 = vrot.slane %v1019_v11, 1 }
 0x4e9   : > { %v3489_v55 = vsub.f32 %v4361_v32, %v1093_v30  ;;  %v3498_v33 = vsub.f32 %v4363_v41, %v1090_v20  ;;  %v843_v45 = vrot.slane %v842_v37, 2  ;;  %v419_v41 = vld [vmem:[%s4193_s6] sm:$0x1] }
 0x4ea   : > { %1176 = vmatpush.msrb.mxu2 %v3430_v29  ;;  %v1021_v2 = vadd.f32 %v1020_v54, %v1019_v11  ;;  %v4367_v54 = vld [vmem:[#allocation25_spill] sm:$0xff] }
 0x4eb   : > { %v844_v20 = vadd.f32 %v843_v45, %v842_v37  ;;  %v436_v37 = vld [vmem:[%s4195_s8] sm:$0x1] }
 0x4ec   : > { %1359 = vmatpush.xpose.msra.mxu1 %v3430_v29  ;;  %1177 = vmatpush.msrb.mxu2 %v3435_v4  ;;  %v1054_v17 = vmul.f32 0.01, %v1021_v2  ;;  %v666_v2 = vrot.slane %v4367_v54, 4 }
 0x4ed   : > { %v845_v58 = vrot.slane %v844_v20, 1 }
 0x4ee   : > { %1178 = vmatpush.msrb.mxu2 %v3439_v61  ;;  %v3520_v26 = vsub.f32 %v402_v42, %v1054_v17  ;;  %v667_v39 = vadd.f32 %v666_v2, %v4367_v54 }
 0x4ef   : > { %v846_v32 = vadd.f32 %v845_v58, %v844_v20 }
 0x4f0   : > { %1360 = vmatpush.xpose.msra.mxu1 %v3435_v4  ;;  %1179 = vmatpush.msrb.mxu2 %v3444_v3  ;;  %4365 = vst [vmem:[#allocation5_spill] sm:$0xff] %v3520_v26  ;;  %v1125_v52 = vperm.slane %v3520_v26, 0  ;;  %v668_v17 = vrot.slane %v667_v39, 2 }
 0x4f1   : > { %v1088_v0 = vmul.f32 0.01, %v846_v32 }
 0x4f2   : > { %1180 = vmatpush.msrb.mxu2 %v3449_v9  ;;  %v669_v42 = vadd.f32 %v668_v17, %v667_v39 }
 0x4f3   : > { %v3531_v34 = vsub.f32 %v419_v41, %v1088_v0  ;;  %v4369_v0 = vld [vmem:[#allocation18_spill] sm:$0xff] }
 0x4f4   : > { %1361 = vmatpush.xpose.msra.mxu1 %v3439_v61  ;;  %1181 = vmatpush.msrb.mxu2 %v3455_v43 }
 0x4f5   : > { %4366 = vst [vmem:[#allocation6_spill] sm:$0xff] %v3531_v34  ;;  %v1149_v8 = vperm.slane %v3531_v34, 0  ;;  %v4387_v34 = vld [vmem:[#allocation33_spill] sm:$0xff] }
 0x4f6   : > { %1182 = vmatpush.msrb.mxu2 %v3460_v28 }
 0x4f8   : > { %1362 = vmatpush.xpose.msra.mxu1 %v3444_v3  ;;  %1183 = vmatpush.msrb.mxu2 %v3466_v23 }
 0x4fa   : > { %1184 = vmatpush.msrb.mxu2 %v3471_v10 }
 0x4fc   : > { %1363 = vmatpush.xpose.msra.mxu1 %v3449_v9  ;;  %1185 = vmatpush.msrb.mxu2 %v3477_v12 }
 0x4fe   : > { %1186 = vmatpush.msrb.mxu2 %v3482_v48 }
 0x500   : > { %1364 = vmatpush.xpose.msra.mxu1 %v3455_v43  ;;  %1187 = vmatpush.msrb.mxu2 %v3489_v55 }
 0x502   : > { %1188 = vmatpush.msrb.mxu2 %v3493_v62 }
 0x504   : > { %1365 = vmatpush.xpose.msra.mxu1 %v3460_v28  ;;  %1189 = vmatpush.msrb.mxu2 %v3501_v6 }
 0x506   : > { %1190 = vmatpush.msrb.mxu2 %v3498_v33 }
 0x508   : > { %1366 = vmatpush.xpose.msra.mxu1 %v3466_v23 }
 0x50c   : > { %1367 = vmatpush.xpose.msra.mxu1 %v3471_v10 }
 0x510   : > { %1368 = vmatpush.xpose.msra.mxu1 %v3477_v12 }
 0x514   : > { %1369 = vmatpush.xpose.msra.mxu1 %v3482_v48 }
 0x518   : > { %1370 = vmatpush.xpose.msra.mxu1 %v3489_v55 }
 0x51c   : > { %1371 = vmatpush.xpose.msra.mxu1 %v3493_v62 }
 0x520   : > { %1372 = vmatpush.xpose.msra.mxu1 %v3501_v6 }
 0x524   : > { %1373 = vmatpush.xpose.msra.mxu1 %v3498_v33 }
 0x55b   : > { %v1144_v25 = vpop.f32.mrf.mxu2 }
 0x55c   : > { %v3523_v30 = vadd.f32 %v1144_v25, %v1125_v52  ;;  %v670_v52 = vrot.slane %v669_v42, 1 }
 0x55e   : > { %v1147_v51 = vmax.f32 %v3523_v30, 0.0  ;;  %v671_v25 = vadd.f32 %v670_v52, %v669_v42  ;;  %v4370_v52 = vld [vmem:[#allocation23_spill] sm:$0xff]  ;;  %vm1553_vm5 = vcmp.gt.f32.partialorder %v3523_v30, 0.0 }
 0x560   : > { %1167 = vmatmul.f32.vlgmr.msrb.gmra.mxu3 %v1147_v51  ;;  %v1122_v44 = vmul.f32 0.01, %v671_v25 }
 0x562   : > { %v3539_v45 = vsub.f32 %v436_v37, %v1122_v44 }
 0x564   : > { %4368 = vst [vmem:[#allocation7_spill] sm:$0xff] %v3539_v45  ;;  %v1173_v20 = vperm.slane %v3539_v45, 0 }
 0x5e3   : > { %v1168_v63 = vpop.f32.mrf.mxu3 }
 0x5e4   : > { %v1169_v35 = vadd.f32 %v1168_v63, %v1149_v8 }
 0x5e6   : > { %v1171_v11 = vmax.f32 %v1169_v35, 0.0  ;;  %vm1378_vm4 = vcmp.gt.f32.partialorder %v1169_v35, 0.0 }
 0x5e8   : > { %1191 = vmatmul.f32.vlgmr.msrb.gmra.mxu2 %v1171_v11 }
 0x66b   : > { %v1192_v58 = vpop.f32.mrf.mxu2 }
 0x66c   : > { %v1193_v32 = vadd.f32 %v1192_v58, %v1173_v20 }
 0x66e   : > { %v1195_v41 = vadd.f32 %v1193_v32, %v4369_v0 }
 0x670   : > { %1196 = vmax.xlane.f32.xlu2 %v1195_v41 }
 0x6e3   : > { %v1197_v8 = vpop.xlane.xlu2 %1196 }
 0x6e4   : > { %v1198_v63 = vsub.f32 %v1195_v41, %v1197_v8 }
 0x6e6   : > { %v1199_v54 = vmul.f32 1.442695, %v1198_v63 }
 0x6e8   : > { %2692 = vpow2.f32 %v1199_v54  ;;  %v4372_v54 = vmov 0.0  }
 0x6ee   : > { %v2693_v2 = vpop.eup %2692 }
 0x6ef   : > { %1201 = vadd.xlane.f32.xlu0 %v2693_v2 }
 0x718   : > { %1382 = vxpose.xlu0.b32.start.end [1/1] (short) %v1147_v51, 128 }
 0x762   : > { %v1202_v39 = vpop.xlane.xlu0 %1201 }
 0x763   : > { %2694 = vrcp.f32 %v1202_v39 }
 0x769   : > { %v2695_v17 = vpop.eup %2694 }
 0x76a   : > { %v1204_v42 = vmul.f32 %v2695_v17, %v2693_v2  ;;  %v2574_v2 = vsel %vm1378_vm4, 1.0, %v4372_v54 }
 0x76c   : > { %v1205_v25 = vsub.f32 %v1204_v42, %v4370_v52 }
 0x76e   : > { %v3544_v44 = vmul.f32 0.125, %v1205_v25 }
 0x770   : > { %4371 = vst [vmem:[#allocation8_spill] sm:$0xff] %v3544_v44  ;;  %1302 = vmatpush.msra.mxu3 %v3544_v44  ;;  %1374 = vmatmul.f32.vlgmr.msra.gmra.mxu1 %v3544_v44 }
 0x798   : > { %1207 = vxpose.xlu0.b32.start.end [1/1] (short) %v1171_v11, 128 }
 0x7bc   : > { %v1398_v37 = vpop.trf.xlu0 }
 0x7c4   : > { %v1399_v20 = vpop.trf.xlu0 }
 0x7cc   : > { %v1400_v58 = vpop.trf.xlu0 }
 0x7d4   : > { %v1401_v32 = vpop.trf.xlu0 }
 0x7dc   : > { %v1402_v41 = vpop.trf.xlu0 }
 0x7e4   : > { %v1403_v8 = vpop.trf.xlu0 }
 0x7ec   : > { %v1404_v51 = vpop.trf.xlu0 }
 0x7ed   : > { %v1375_v63 = vpop.f32.mrf.mxu1 }
 0x7ee   : > { %v3549_v39 = vmul.f32 %v2574_v2, %v1375_v63 }
 0x7f0   : > { %4373 = vst [vmem:[#allocation9_spill] sm:$0xff] %v3549_v39  ;;  %1477 = vmatpush.msrb.mxu1 %v3549_v39  ;;  %2660 = vmatpush.msra.mxu2 %v3549_v39 }
 0x7f1   : > { %1549 = vmatmul.f32.vlgmr.msrb.gmra.mxu0 %v3549_v39  ;;  %2575 = vmatmul.msk.f32.vlgmr.msrb.gmra.mxu1 %vm552_vm2, %v1398_v37  ;;  %v4388_v39 = vld [vmem:[#allocation34_spill] sm:$0xff] }
 0x7f2   : > { %2576 = vmatmul.msk.f32.vlgmr.msra.gmra.mxu2 %vm552_vm2, %v1399_v20 }
 0x7f4   : > { %v1405_v11 = vpop.trf.xlu0 }
 0x7fa   : > { %2577 = vmatmul.msk.f32.gmra.mxu2 %vm552_vm2, %v1400_v58 }
 0x7fc   : > { %v1406_v35 = vpop.trf.xlu0 }
 0x802   : > { %2578 = vmatmul.msk.f32.gmra.mxu2 %vm552_vm2, %v1401_v32 }
 0x804   : > { %v1407_v17 = vpop.trf.xlu0 }
 0x80a   : > { %2579 = vmatmul.msk.f32.gmra.mxu2 %vm552_vm2, %v1402_v41 }
 0x80c   : > { %v1408_v42 = vpop.trf.xlu0 }
 0x812   : > { %2580 = vmatmul.msk.f32.gmra.mxu2 %vm552_vm2, %v1403_v8 }
 0x814   : > { %v1409_v52 = vpop.trf.xlu0 }
 0x81a   : > { %2581 = vmatmul.msk.f32.gmra.mxu2 %vm552_vm2, %v1404_v51 }
 0x81c   : > { %v1410_v25 = vpop.trf.xlu0 }
 0x822   : > { %2582 = vmatmul.msk.f32.gmra.mxu2 %vm552_vm2, %v1405_v11 }
 0x824   : > { %v1411_v37 = vpop.trf.xlu0 }
 0x82a   : > { %2583 = vmatmul.msk.f32.gmra.mxu2 %vm552_vm2, %v1406_v35 }
 0x82c   : > { %v1412_v20 = vpop.trf.xlu0 }
 0x832   : > { %2584 = vmatmul.msk.f32.gmra.mxu2 %vm552_vm2, %v1407_v17  ;;  %v2591_v17 = vsel %vm1553_vm5, 1.0, %v4372_v54 }
 0x834   : > { %v1413_v58 = vpop.trf.xlu0 }
 0x83a   : > { %2585 = vmatmul.msk.f32.gmra.mxu2 %vm552_vm2, %v1408_v42 }
 0x83c   : > { %v1223_v32 = vpop.trf.xlu0 }
 0x83d   : > { %2558 = vmatmul.msk.f32.vlgmr.msra.gmra.mxu3 %vm552_vm2, %v1223_v32  ;;  %v4377_v32 = vld [vmem:[#allocation21_spill] sm:$0xff] }
 0x842   : > { %2586 = vmatmul.msk.f32.gmra.mxu2 %vm552_vm2, %v1409_v52  ;;  %v4375_v52 = vld [vmem:[#allocation19_spill] sm:$0xff] }
 0x844   : > { %v1224_v41 = vpop.trf.xlu0 }
 0x845   : > { %2559 = vmatmul.msk.f32.gmra.mxu3 %vm552_vm2, %v1224_v41 }
 0x84a   : > { %2587 = vmatmul.msk.f32.gmra.mxu2 %vm552_vm2, %v1410_v25 }
 0x84c   : > { %v1225_v8 = vpop.trf.xlu0 }
 0x84d   : > { %2560 = vmatmul.msk.f32.gmra.mxu3 %vm552_vm2, %v1225_v8 }
 0x852   : > { %2588 = vmatmul.msk.f32.gmra.mxu2 %vm552_vm2, %v1411_v37 }
 0x854   : > { %v1226_v51 = vpop.trf.xlu0 }
 0x855   : > { %2561 = vmatmul.msk.f32.gmra.mxu3 %vm552_vm2, %v1226_v51  ;;  %v4378_v51 = vld [vmem:[#allocation22_spill] sm:$0xff] }
 0x85a   : > { %2589 = vmatmul.msk.f32.gmra.mxu2 %vm552_vm2, %v1412_v20  ;;  %v4376_v20 = vld [vmem:[#allocation20_spill] sm:$0xff] }
 0x85c   : > { %v1227_v63 = vpop.trf.xlu0 }
 0x85d   : > { %2562 = vmatmul.msk.f32.gmra.mxu3 %vm552_vm2, %v1227_v63 }
 0x862   : > { %2590 = vmatmul.msk.f32.gmra.mxu2 %vm552_vm2, %v1413_v58 }
 0x864   : > { %v1228_v2 = vpop.trf.xlu0 }
 0x865   : > { %2563 = vmatmul.msk.f32.gmra.mxu3 %vm552_vm2, %v1228_v2 }
 0x86c   : > { %v1229_v11 = vpop.trf.xlu0 }
 0x86d   : > { %2564 = vmatmul.msk.f32.gmra.mxu3 %vm552_vm2, %v1229_v11  ;;  %v4379_v11 = vld [vmem:[#allocation24_spill] sm:$0xff] }
 0x86e   : > { %v1550_v35 = vpop.f32.mrf.mxu0  ;;  %v1479_v21 = vpop.f32.mrf.mxu1 }
 0x86f   : > { %v3579_v42 = vmul.f32 %v2591_v17, %v1550_v35 }
 0x871   : > { %4374 = vst [vmem:[#allocation10_spill] sm:$0xff] %v3579_v42  ;;  %1572 = vmatpush.msra.mxu1 %v3579_v42 }
 0x872   : > { %2592 = vmatmul.msk.f32.vlgmr.msra.gmra.mxu1 %vm552_vm2, %v4375_v52 }
 0x874   : > { %v1230_v25 = vpop.trf.xlu0 }
 0x875   : > { %v3584_v37 = vpop.f32.mrf.mxu2  ;;  %2565 = vmatmul.msk.f32.gmra.mxu3 %vm552_vm2, %v1230_v25  ;;  %v4380_v25 = vld [vmem:[#allocation26_spill] sm:$0xff] }
 0x87a   : > { %2593 = vmatmul.msk.f32.gmra.mxu1 %vm552_vm2, %v4376_v20 }
 0x87c   : > { %v1231_v30 = vpop.trf.xlu0 }
 0x87d   : > { %v3589_v58 = vpop.f32.mrf.mxu2  ;;  %2566 = vmatmul.msk.f32.gmra.mxu3 %vm552_vm2, %v1231_v30 }
 0x882   : > { %2594 = vmatmul.msk.f32.gmra.mxu1 %vm552_vm2, %v4377_v32 }
 0x884   : > { %v1232_v41 = vpop.trf.xlu0 }
 0x885   : > { %v3594_v8 = vpop.f32.mrf.mxu2  ;;  %2567 = vmatmul.msk.f32.gmra.mxu3 %vm552_vm2, %v1232_v41 }
 0x88a   : > { %2595 = vmatmul.msk.f32.gmra.mxu1 %vm552_vm2, %v4378_v51  ;;  %v4381_v51 = vld [vmem:[#allocation27_spill] sm:$0xff] }
 0x88c   : > { %v1233_v63 = vpop.trf.xlu0 }
 0x88d   : > { %v3599_v2 = vpop.f32.mrf.mxu2  ;;  %2568 = vmatmul.msk.f32.gmra.mxu3 %vm552_vm2, %v1233_v63 }
 0x892   : > { %2596 = vmatmul.msk.f32.gmra.mxu1 %vm552_vm2, %v4379_v11  ;;  %v4382_v11 = vld [vmem:[#allocation28_spill] sm:$0xff] }
 0x894   : > { %v1234_v35 = vpop.trf.xlu0 }
 0x895   : > { %v3604_v17 = vpop.f32.mrf.mxu2  ;;  %2569 = vmatmul.msk.f32.gmra.mxu3 %vm552_vm2, %v1234_v35  ;;  %v4383_v35 = vld [vmem:[#allocation29_spill] sm:$0xff] }
 0x89a   : > { %2597 = vmatmul.msk.f32.gmra.mxu1 %vm552_vm2, %v4380_v25 }
 0x89c   : > { %v1235_v30 = vpop.trf.xlu0 }
 0x89d   : > { %v1497_v41 = vpop.f32.mrf.mxu2  ;;  %2570 = vmatmul.msk.f32.gmra.mxu3 %vm552_vm2, %v1235_v30  ;;  %v4384_v30 = vld [vmem:[#allocation30_spill] sm:$0xff] }
 0x8a2   : > { %2598 = vmatmul.msk.f32.gmra.mxu1 %vm552_vm2, %v4381_v51 }
 0x8a4   : > { %v1236_v32 = vpop.trf.xlu0 }
 0x8a5   : > { %v1500_v63 = vpop.f32.mrf.mxu2  ;;  %2571 = vmatmul.msk.f32.gmra.mxu3 %vm552_vm2, %v1236_v32  ;;  %v4385_v32 = vld [vmem:[#allocation31_spill] sm:$0xff] }
 0x8aa   : > { %2599 = vmatmul.msk.f32.gmra.mxu1 %vm552_vm2, %v4382_v11 }
 0x8ac   : > { %v1237_v20 = vpop.trf.xlu0 }
 0x8ad   : > { %v1503_v52 = vpop.f32.mrf.mxu2  ;;  %2572 = vmatmul.msk.f32.gmra.mxu3 %vm552_vm2, %v1237_v20  ;;  %v4386_v20 = vld [vmem:[#allocation32_spill] sm:$0xff] }
 0x8b2   : > { %2600 = vmatmul.msk.f32.gmra.mxu1 %vm552_vm2, %v4383_v35 }
 0x8b4   : > { %v1238_v25 = vpop.trf.xlu0 }
 0x8b5   : > { %v1506_v54 = vpop.f32.mrf.mxu2  ;;  %2573 = vmatmul.msk.f32.gmra.mxu3 %vm552_vm2, %v1238_v25 }
 0x8ba   : > { %2601 = vmatmul.msk.f32.gmra.mxu1 %vm552_vm2, %v4384_v30 }
 0x8bd   : > { %v1509_v51 = vpop.f32.mrf.mxu2 }
 0x8c0   : > { %v3621_v0 = vpop.f32.mrf.mxu3 }
 0x8c2   : > { %2602 = vmatmul.msk.f32.gmra.mxu1 %vm552_vm2, %v4385_v32 }
 0x8c5   : > { %v1512_v11 = vpop.f32.mrf.mxu2 }
 0x8c8   : > { %v3625_v45 = vpop.f32.mrf.mxu3 }
 0x8ca   : > { %2603 = vmatmul.msk.f32.gmra.mxu1 %vm552_vm2, %v4386_v20 }
 0x8cd   : > { %v1515_v35 = vpop.f32.mrf.mxu2 }
 0x8ce   : > { %v1674_v15 = vmul.f32 0.01, %v1515_v35  ;;  %v1671_v35 = vmul.f32 0.01, %v1506_v54  ;;  %v4395_v54 = vld [vmem:[#allocation35_spill] sm:$0xff] }
 0x8d0   : > { %v3629_v44 = vpop.f32.mrf.mxu3 }
 0x8d2   : > { %2604 = vmatmul.msk.f32.gmra.mxu1 %vm552_vm2, %v4387_v34 }
 0x8d5   : > { %v1518_v25 = vpop.f32.mrf.mxu2 }
 0x8d6   : > { %v1675_v19 = vmul.f32 0.01, %v1518_v25  ;;  %v4397_v25 = vld [vmem:[#allocation36_spill] sm:$0xff] }
 0x8d8   : > { %v3633_v30 = vpop.f32.mrf.mxu3 }
 0x8da   : > { %2605 = vmatmul.msk.f32.gmra.mxu1 %vm552_vm2, %v4388_v39 }
 0x8dd   : > { %v1521_v26 = vpop.f32.mrf.mxu2 }
 0x8de   : > { %v1676_v20 = vmul.f32 0.01, %v1521_v26  ;;  %v1673_v26 = vmul.f32 0.01, %v1512_v11 }
 0x8e0   : > { %v3637_v32 = vpop.f32.mrf.mxu3  ;;  %v3647_v13 = vsub.f32 %v3238_v50, %v1676_v20  ;;  %v3665_v20 = vsub.f32 %v3255_v57, %v1673_v26  ;;  %v1668_v57 = vmul.f32 0.01, %v1497_v41  ;;  %v1666_v41 = vmul.f32 0.01, %v3599_v2 }
 0x8e2   : > { %2606 = vmatmul.msk.f32.gmra.mxu1 %vm552_vm2, %v3152_v60  ;;  %4389 = vst [vmem:[#allocation11_spill] sm:$0xff] %v3647_v13 }
 0x8e3   : > { %4392 = vst [vmem:[#allocation14_spill] sm:$0xff] %v3665_v20 }
 0x8e5   : > { %v1524_v42 = vpop.f32.mrf.mxu2 }
 0x8e6   : > { %v1677_v18 = vmul.f32 0.01, %v1524_v42  ;;  %v3654_v42 = vsub.f32 %v3243_v53, %v1675_v19  ;;  %v1670_v19 = vmul.f32 0.01, %v1503_v52  ;;  %v1667_v52 = vmul.f32 0.01, %v3604_v17 }
 0x8e8   : > { %v3642_v31 = vsub.f32 %v3235_v56, %v1677_v18  ;;  %v3644_v34 = vpop.f32.mrf.mxu3  ;;  %4390 = vst [vmem:[#allocation12_spill] sm:$0xff] %v3654_v42  ;;  %v1672_v56 = vmul.f32 0.01, %v1509_v51  ;;  %v3658_v18 = vsub.f32 %v3248_v5, %v1674_v15  ;;  %v1669_v5 = vmul.f32 0.01, %v1500_v63  ;;  %v4399_v63 = vld [vmem:[#allocation37_spill] sm:$0xff] }
 0x8e9   : > { %v3676_v15 = vsub.f32 %v3266_v47, %v1671_v35  ;;  %v3680_v11 = vsub.f32 %v4395_v54, %v1670_v19  ;;  %v1665_v35 = vmul.f32 0.01, %v3594_v8  ;;  %v4401_v19 = vld [vmem:[#allocation38_spill] sm:$0xff]  ;;  %v4403_v54 = vld [vmem:[#allocation39_spill] sm:$0xff] }
 0x8ea   : > { %2607 = vmatmul.msk.f32.gmra.mxu1 %vm552_vm2, %v3154_v49  ;;  %1757 = vmatpush.msrb.mxu3 %v3642_v31  ;;  %4391 = vst [vmem:[#allocation13_spill] sm:$0xff] %v3658_v18  ;;  %v3671_v51 = vsub.f32 %v3259_v59, %v1672_v56  ;;  %v3688_v26 = vsub.f32 %v4397_v25, %v1669_v5  ;;  %v1664_v5 = vmul.f32 0.01, %v3589_v58 }
 0x8eb   : > { %2139 = vmatpush.xpose.msrb.mxu1 %v3642_v31  ;;  %4394 = vst [vmem:[#allocation17_spill] sm:$0xff] %v3676_v15  ;;  %v3695_v56 = vsub.f32 %v4399_v63, %v1668_v57  ;;  %v3701_v17 = vsub.f32 %v4401_v19, %v1667_v52  ;;  %v3706_v25 = vsub.f32 %v4403_v54, %v1666_v41  ;;  %v1663_v57 = vmul.f32 0.01, %v3584_v37  ;;  %v4405_v63 = vld [vmem:[#allocation40_spill] sm:$0xff]  ;;  %v4409_v41 = vld [vmem:[#allocation43_spill] sm:$0xff]  ;;  %v4411_v37 = vld [vmem:[#allocation42_spill] sm:$0xff] }
 0x8ec   : > { %1758 = vmatpush.msrb.mxu3 %v3647_v13  ;;  %4393 = vst [vmem:[#allocation15_spill] sm:$0xff] %v3671_v51  ;;  %v3714_v8 = vsub.f32 %v4405_v63, %v1665_v35  ;;  %v1662_v19 = vmul.f32 0.01, %v1479_v21 }
 0x8ed   : > { %4396 = vst [vmem:[#allocation16_spill] sm:$0xff] %v3680_v11  ;;  %v3723_v54 = vsub.f32 %v4409_v41, %v1663_v57 }
 0x8ee   : > { %1759 = vmatpush.msrb.mxu3 %v3654_v42  ;;  %4398 = vst [vmem:[#allocation25_spill] sm:$0xff] %v3688_v26 }
 0x8ef   : > { %2140 = vmatpush.xpose.msrb.mxu1 %v3647_v13  ;;  %v3662_v50 = vpop.f32.mrf.mxu1  ;;  %4400 = vst [vmem:[#allocation23_spill] sm:$0xff] %v3695_v56 }
 0x8f0   : > { %1760 = vmatpush.msrb.mxu3 %v3658_v18  ;;  %v3668_v53 = vpop.f32.mrf.mxu3  ;;  %4402 = vst [vmem:[#allocation34_spill] sm:$0xff] %v3701_v17 }
 0x8f1   : > { %4404 = vst [vmem:[#allocation35_spill] sm:$0xff] %v3706_v25 }
 0x8f2   : > { %1761 = vmatpush.msrb.mxu3 %v3665_v20  ;;  %4406 = vst [vmem:[#allocation36_spill] sm:$0xff] %v3714_v8 }
 0x8f3   : > { %2141 = vmatpush.xpose.msrb.mxu1 %v3654_v42  ;;  %4410 = vst [vmem:[#allocation38_spill] sm:$0xff] %v3723_v54 }
 0x8f4   : > { %1762 = vmatpush.msrb.mxu3 %v3671_v51 }
 0x8f6   : > { %1763 = vmatpush.msrb.mxu3 %v3676_v15 }
 0x8f7   : > { %2142 = vmatpush.xpose.msrb.mxu1 %v3658_v18  ;;  %v3684_v59 = vpop.f32.mrf.mxu1 }
 0x8f8   : > { %1764 = vmatpush.msrb.mxu3 %v3680_v11  ;;  %v3691_v47 = vpop.f32.mrf.mxu3 }
 0x8fa   : > { %1765 = vmatpush.msrb.mxu3 %v3688_v26 }
 0x8fb   : > { %2143 = vmatpush.xpose.msrb.mxu1 %v3665_v20  ;;  %v4407_v20 = vld [vmem:[#allocation41_spill] sm:$0xff] }
 0x8fc   : > { %1766 = vmatpush.msrb.mxu3 %v3695_v56  ;;  %v3718_v58 = vsub.f32 %v4407_v20, %v1664_v5 }
 0x8fe   : > { %1767 = vmatpush.msrb.mxu3 %v3701_v17  ;;  %4408 = vst [vmem:[#allocation37_spill] sm:$0xff] %v3718_v58 }
 0x8ff   : > { %2144 = vmatpush.xpose.msrb.mxu1 %v3671_v51  ;;  %v3710_v2 = vpop.f32.mrf.mxu1  ;;  %v3727_v51 = vsub.f32 %v4411_v37, %v1662_v19 }
 0x900   : > { %1768 = vmatpush.msrb.mxu3 %v3706_v25  ;;  %v1328_v52 = vpop.f32.mrf.mxu3 }
 0x901   : > { %4412 = vst [vmem:[#allocation39_spill] sm:$0xff] %v3727_v51 }
 0x902   : > { %1769 = vmatpush.msrb.mxu3 %v3714_v8 }
 0x903   : > { %2145 = vmatpush.xpose.msrb.mxu1 %v3676_v15 }
 0x904   : > { %1770 = vmatpush.msrb.mxu3 %v3718_v58 }
 0x906   : > { %1771 = vmatpush.msrb.mxu3 %v3723_v54 }
 0x907   : > { %2146 = vmatpush.xpose.msrb.mxu1 %v3680_v11  ;;  %v3731_v21 = vpop.f32.mrf.mxu1 }
 0x908   : > { %1772 = vmatpush.msrb.mxu3 %v3727_v51  ;;  %v1331_v20 = vpop.f32.mrf.mxu3 }
 0x90b   : > { %2147 = vmatpush.xpose.msrb.mxu1 %v3688_v26 }
 0x90f   : > { %2148 = vmatpush.xpose.msrb.mxu1 %v3695_v56  ;;  %v3736_v35 = vpop.f32.mrf.mxu1 }
 0x910   : > { %v1334_v5 = vpop.f32.mrf.mxu3 }
 0x913   : > { %2149 = vmatpush.xpose.msrb.mxu1 %v3701_v17 }
 0x917   : > { %2150 = vmatpush.xpose.msrb.mxu1 %v3706_v25  ;;  %v3740_v57 = vpop.f32.mrf.mxu1 }
 0x918   : > { %v1337_v63 = vpop.f32.mrf.mxu3 }
 0x91b   : > { %2151 = vmatpush.xpose.msrb.mxu1 %v3714_v8 }
 0x91f   : > { %2152 = vmatpush.xpose.msrb.mxu1 %v3718_v58  ;;  %v3744_v19 = vpop.f32.mrf.mxu1 }
 0x920   : > { %v1340_v41 = vpop.f32.mrf.mxu3 }
 0x921   : > { %v1708_v42 = vmul.f32 0.01, %v1340_v41 }
 0x923   : > { %2153 = vmatpush.xpose.msrb.mxu1 %v3723_v54 }
 0x927   : > { %2154 = vmatpush.xpose.msrb.mxu1 %v3727_v51  ;;  %v3748_v37 = vpop.f32.mrf.mxu1 }
 0x928   : > { %v1343_v56 = vpop.f32.mrf.mxu3 }
 0x929   : > { %v1709_v18 = vmul.f32 0.01, %v1343_v56  ;;  %v1705_v56 = vmul.f32 0.01, %v1331_v20 }
 0x92b   : > { %v3763_v13 = vsub.f32 %v3435_v4, %v1709_v18  ;;  %v1704_v18 = vmul.f32 0.01, %v1328_v52 }
 0x92f   : > { %v3750_v17 = vpop.f32.mrf.mxu1 }
 0x930   : > { %v1346_v25 = vpop.f32.mrf.mxu3 }
 0x931   : > { %v1710_v8 = vmul.f32 0.01, %v1346_v25  ;;  %v3767_v25 = vsub.f32 %v3439_v61, %v1708_v42  ;;  %v3779_v61 = vsub.f32 %v3455_v43, %v1705_v56  ;;  %v1703_v42 = vmul.f32 0.01, %v3691_v47 }
 0x932   : > { %v1701_v43 = vmul.f32 0.01, %v3644_v34 }
 0x933   : > { %v3759_v54 = vsub.f32 %v3430_v29, %v1710_v8  ;;  %4413 = vst [vmem:[#allocation40_spill] sm:$0xff] %v3767_v25  ;;  %v3789_v20 = vsub.f32 %v3466_v23, %v1703_v42  ;;  %v1699_v23 = vmul.f32 0.01, %v3633_v30 }
 0x934   : > { %4416 = vst [vmem:[#allocation42_spill] sm:$0xff] %v3779_v61  ;;  %v3799_v47 = vsub.f32 %v3477_v12, %v1701_v43 }
 0x935   : > { %4418 = vst [vmem:[#allocation51_spill] sm:$0xff] %v3789_v20  ;;  %v3812_v12 = vsub.f32 %v3489_v55, %v1699_v23 }
 0x936   : > { %4420 = vst [vmem:[#allocation53_spill] sm:$0xff] %v3799_v47 }
 0x937   : > { %v3752_v26 = vpop.f32.mrf.mxu1  ;;  %4422 = vst [vmem:[#allocation55_spill] sm:$0xff] %v3812_v12 }
 0x938   : > { %v1349_v11 = vpop.f32.mrf.mxu3 }
 0x939   : > { %v1711_v15 = vmul.f32 0.01, %v1349_v11  ;;  %v1707_v11 = vmul.f32 0.01, %v1337_v63 }
 0x93b   : > { %v3755_v58 = vsub.f32 %v3427_v27, %v1711_v15  ;;  %v1706_v15 = vmul.f32 0.01, %v1334_v5  ;;  %v3771_v29 = vsub.f32 %v3444_v3, %v1707_v11  ;;  %v3784_v3 = vsub.f32 %v3460_v28, %v1704_v18 }
 0x93c   : > { %v1700_v28 = vmul.f32 0.01, %v3637_v32  ;;  %v1698_v32 = vmul.f32 0.01, %v3629_v44 }
 0x93d   : > { %1964 = vmatpush.xpose.msrb.mxu2 %v3755_v58  ;;  %4414 = vst [vmem:[#allocation41_spill] sm:$0xff] %v3771_v29  ;;  %v3775_v8 = vsub.f32 %v3449_v9, %v1706_v15  ;;  %v1702_v9 = vmul.f32 0.01, %v3668_v53 }
 0x93e   : > { %4417 = vst [vmem:[#allocation50_spill] sm:$0xff] %v3784_v3  ;;  %v3804_v53 = vsub.f32 %v3482_v48, %v1700_v28  ;;  %v3825_v44 = vsub.f32 %v3493_v62, %v1698_v32  ;;  %v4431_v28 = vld [vmem:[#allocation49_spill] sm:$0xff] }
 0x93f   : > { %v1604_v51 = vpop.f32.mrf.mxu1  ;;  %4415 = vst [vmem:[#allocation43_spill] sm:$0xff] %v3775_v8  ;;  %v3794_v52 = vsub.f32 %v3471_v10, %v1702_v9  ;;  %v4429_v9 = vld [vmem:[#allocation47_spill] sm:$0xff] }
 0x940   : > { %4421 = vst [vmem:[#allocation54_spill] sm:$0xff] %v3804_v53  ;;  %v1638_v55 = vmul.f32 0.01, %v1604_v51  ;;  %v1636_v51 = vmul.f32 0.01, %v3750_v17 }
 0x941   : > { %1965 = vmatpush.xpose.msrb.mxu2 %v3759_v54  ;;  %4419 = vst [vmem:[#allocation52_spill] sm:$0xff] %v3794_v52 }
 0x942   : > { %4423 = vst [vmem:[#allocation56_spill] sm:$0xff] %v3825_v44  ;;  %v3857_v17 = vsub.f32 %v3385_v22, %v1636_v51  ;;  %v1631_v22 = vmul.f32 0.01, %v3731_v21  ;;  %v1628_v21 = vmul.f32 0.01, %v3662_v50  ;;  %v4432_v50 = vld [vmem:[#allocation10_spill] sm:$0xff] }
 0x944   : > { %v3896_v23 = vsub.f32 %v4431_v28, %v1628_v21 }
 0x945   : > { %1966 = vmatpush.xpose.msrb.mxu2 %v3763_v13 }
 0x947   : > { %v1607_v27 = vpop.f32.mrf.mxu1 }
 0x948   : > { %v1639_v48 = vmul.f32 0.01, %v1607_v27 }
 0x949   : > { %1967 = vmatpush.xpose.msrb.mxu2 %v3767_v25 }
 0x94d   : > { %1968 = vmatpush.xpose.msrb.mxu2 %v3771_v29 }
 0x94f   : > { %v1610_v4 = vpop.f32.mrf.mxu1 }
 0x950   : > { %v1640_v56 = vmul.f32 0.01, %v1610_v4 }
 0x951   : > { %1969 = vmatpush.xpose.msrb.mxu2 %v3775_v8 }
 0x952   : > { %v3828_v4 = vsub.f32 %v3369_v38, %v1640_v56  ;;  %v3843_v38 = vsub.f32 %v3377_v40, %v1638_v55  ;;  %v1633_v40 = vmul.f32 0.01, %v3740_v57  ;;  %v4427_v57 = vld [vmem:[#allocation45_spill] sm:$0xff] }
 0x955   : > { %1970 = vmatpush.xpose.msrb.mxu2 %v3779_v61 }
 0x957   : > { %v1613_v5 = vpop.f32.mrf.mxu1 }
 0x958   : > { %v1641_v10 = vmul.f32 0.01, %v1613_v5 }
 0x959   : > { %1971 = vmatpush.xpose.msrb.mxu2 %v3784_v3 }
 0x95a   : > { %v3820_v18 = vsub.f32 %v3365_v14, %v1641_v10  ;;  %v3834_v14 = vsub.f32 %v3373_v1, %v1639_v48 }
 0x95d   : > { %1972 = vmatpush.xpose.msrb.mxu2 %v3789_v20 }
 0x95f   : > { %v1616_v63 = vpop.f32.mrf.mxu1 }
 0x960   : > { %v1642_v34 = vmul.f32 0.01, %v1616_v63 }
 0x961   : > { %1973 = vmatpush.xpose.msrb.mxu2 %v3794_v52 }
 0x962   : > { %v3815_v30 = vsub.f32 %v3359_v36, %v1642_v34  ;;  %v1637_v36 = vmul.f32 0.01, %v3752_v26  ;;  %v1635_v26 = vmul.f32 0.01, %v3748_v37 }
 0x964   : > { %v3849_v1 = vsub.f32 %v3381_v16, %v1637_v36  ;;  %v3863_v37 = vsub.f32 %v3389_v46, %v1635_v26  ;;  %v1632_v16 = vmul.f32 0.01, %v3736_v35  ;;  %v1630_v46 = vmul.f32 0.01, %v3710_v2  ;;  %v4428_v35 = vld [vmem:[#allocation46_spill] sm:$0xff]  ;;  %v4430_v2 = vld [vmem:[#allocation48_spill] sm:$0xff] }
 0x965   : > { %1974 = vmatpush.xpose.msrb.mxu2 %v3799_v47  ;;  %v3883_v5 = vsub.f32 %v4428_v35, %v1631_v22  ;;  %v4436_v35 = vld [vmem:[#allocation6_spill] sm:$0xff] }
 0x966   : > { %v3878_v42 = vsub.f32 %v4427_v57, %v1632_v16  ;;  %v3888_v43 = vsub.f32 %v4429_v9, %v1630_v46 }
 0x967   : > { %v1619_v41 = vpop.f32.mrf.mxu1 }
 0x968   : > { %v1643_v11 = vmul.f32 0.01, %v1619_v41  ;;  %v1622_v41 = vrot.slane %v4432_v50, 4 }
 0x969   : > { %1975 = vmatpush.xpose.msrb.mxu2 %v3804_v53 }
 0x96a   : > { %v3808_v15 = vsub.f32 %v3356_v24, %v1643_v11  ;;  %v1697_v24 = vmul.f32 0.01, %v3625_v45  ;;  %v1696_v45 = vmul.f32 0.01, %v3621_v0  ;;  %v1623_v34 = vadd.f32 %v1622_v41, %v4432_v50  ;;  %v4438_v50 = vld [vmem:[#allocation8_spill] sm:$0xff] }
 0x96b   : > { %v1352_v41 = vrot.slane %v4438_v50, 4 }
 0x96c   : > { %1733 = vmatpush.msra.mxu0 %v3808_v15  ;;  %v3839_v62 = vsub.f32 %v3501_v6, %v1697_v24  ;;  %v3853_v0 = vsub.f32 %v3498_v33, %v1696_v45  ;;  %v1634_v6 = vmul.f32 0.01, %v3744_v19  ;;  %v4426_v19 = vld [vmem:[#allocation44_spill] sm:$0xff]  ;;  %v1624_v11 = vrot.slane %v1623_v34, 2  ;;  %v4433_v24 = vld [vmem:[#allocation5_spill] sm:$0xff] }
 0x96d   : > { %1976 = vmatpush.xpose.msrb.mxu2 %v3812_v12  ;;  %v3873_v27 = vsub.f32 %v4426_v19, %v1633_v40 }
 0x96e   : > { %1734 = vmatpush.msra.mxu0 %v3815_v30  ;;  %4424 = vst [vmem:[#allocation57_spill] sm:$0xff] %v3839_v62  ;;  %v3868_v33 = vsub.f32 %v3393_v7, %v1634_v6  ;;  %v1629_v7 = vmul.f32 0.01, %v3684_v59  ;;  %v2700_v59 = vld [vmem:[%s2832_s27] sm:$0xff]  ;;  %v1625_v10 = vadd.f32 %v1624_v11, %v1623_v34  ;;  %v1353_v34 = vadd.f32 %v1352_v41, %v4438_v50 }
 0x96f   : > { %4425 = vst [vmem:[#allocation58_spill] sm:$0xff] %v3853_v0  ;;  %v4435_v6 = vld [vmem:[#allocation9_spill] sm:$0xff] }
 0x970   : > { %1735 = vmatpush.msra.mxu0 %v3820_v18  ;;  %v3892_v63 = vsub.f32 %v4430_v2, %v1629_v7  ;;  %v1626_v32 = vrot.slane %v1625_v10, 1  ;;  %v1527_v40 = vrot.slane %v4435_v6, 4  ;;  %v1354_v11 = vrot.slane %v1353_v34, 2 }
 0x971   : > { %1977 = vmatpush.xpose.msrb.mxu2 %v3825_v44 }
 0x972   : > { %1736 = vmatpush.msra.mxu0 %v3828_v4  ;;  %v1627_v56 = vadd.f32 %v1626_v32, %v1625_v10  ;;  %v1528_v16 = vadd.f32 %v1527_v40, %v4435_v6  ;;  %v1355_v10 = vadd.f32 %v1354_v11, %v1353_v34 }
 0x974   : > { %1737 = vmatpush.msra.mxu0 %v3834_v14  ;;  %v1660_v48 = vmul.f32 0.01, %v1627_v56  ;;  %v1529_v22 = vrot.slane %v1528_v16, 2  ;;  %v1356_v32 = vrot.slane %v1355_v10, 1 }
 0x975   : > { %1978 = vmatpush.xpose.msrb.mxu2 %v3839_v62 }
 0x976   : > { %1738 = vmatpush.msra.mxu0 %v3843_v38  ;;  %v3920_v55 = vsub.f32 %v4433_v24, %v1660_v48  ;;  %v1530_v19 = vadd.f32 %v1529_v22, %v1528_v16  ;;  %v1357_v56 = vadd.f32 %v1356_v32, %v1355_v10  ;;  %v4439_v24 = vld [vmem:[#allocation7_spill] sm:$0xff]  ;;  %v4441_v16 = vld [vmem:[#allocation18_spill] sm:$0xff] }
 0x978   : > { %1739 = vmatpush.msra.mxu0 %v3849_v1  ;;  %4434 = vst [vmem:[#allocation44_spill] sm:$0xff] %v3920_v55  ;;  %v1731_v36 = vperm.slane %v3920_v55, 0  ;;  %v1531_v46 = vrot.slane %v1530_v19, 1  ;;  %v1728_v48 = vmul.f32 0.01, %v1357_v56 }
 0x979   : > { %1979 = vmatpush.xpose.msrb.mxu2 %v3853_v0 }
 0x97a   : > { %1740 = vmatpush.msra.mxu0 %v3857_v17  ;;  %v1532_v57 = vadd.f32 %v1531_v46, %v1530_v19 }
 0x97c   : > { %1741 = vmatpush.msra.mxu0 %v3863_v37  ;;  %v1694_v7 = vmul.f32 0.01, %v1532_v57 }
 0x97e   : > { %1742 = vmatpush.msra.mxu0 %v3868_v33  ;;  %v3929_v21 = vsub.f32 %v4436_v35, %v1694_v7 }
 0x980   : > { %1743 = vmatpush.msra.mxu0 %v3873_v27  ;;  %4437 = vst [vmem:[#allocation45_spill] sm:$0xff] %v3929_v21  ;;  %v1755_v9 = vperm.slane %v3929_v21, 0 }
 0x982   : > { %1744 = vmatpush.msra.mxu0 %v3878_v42 }
 0x984   : > { %1745 = vmatpush.msra.mxu0 %v3883_v5 }
 0x986   : > { %1746 = vmatpush.msra.mxu0 %v3888_v43 }
 0x988   : > { %1747 = vmatpush.msra.mxu0 %v3892_v63 }
 0x98a   : > { %1748 = vmatpush.msra.mxu0 %v3896_v23 }
 0x98b   : > { %1749 = vmatmul.f32.vlgmr.msra.gmra.mxu0 %v2700_v59 }
 0x98c   : > { %1781 = vmatpush.msrb.mxu0 %v3755_v58 }
 0x98e   : > { %1782 = vmatpush.msrb.mxu0 %v3759_v54 }
 0x990   : > { %1783 = vmatpush.msrb.mxu0 %v3763_v13 }
 0x992   : > { %1784 = vmatpush.msrb.mxu0 %v3767_v25 }
 0x994   : > { %1785 = vmatpush.msrb.mxu0 %v3771_v29 }
 0x996   : > { %1786 = vmatpush.msrb.mxu0 %v3775_v8 }
 0x998   : > { %1787 = vmatpush.msrb.mxu0 %v3779_v61 }
 0x99a   : > { %1788 = vmatpush.msrb.mxu0 %v3784_v3 }
 0x99c   : > { %1789 = vmatpush.msrb.mxu0 %v3789_v20 }
 0x99e   : > { %1790 = vmatpush.msrb.mxu0 %v3794_v52 }
 0x9a0   : > { %1791 = vmatpush.msrb.mxu0 %v3799_v47 }
 0x9a2   : > { %1792 = vmatpush.msrb.mxu0 %v3804_v53 }
 0x9a4   : > { %1793 = vmatpush.msrb.mxu0 %v3812_v12 }
 0x9a6   : > { %1794 = vmatpush.msrb.mxu0 %v3825_v44 }
 0x9a8   : > { %1795 = vmatpush.msrb.mxu0 %v3839_v62 }
 0x9aa   : > { %1796 = vmatpush.msrb.mxu0 %v3853_v0 }
 0xa08   : > { %v1750_v45 = vpop.f32.mrf.mxu0 }
 0xa09   : > { %v3923_v51 = vadd.f32 %v1750_v45, %v1731_v36  ;;  %v3938_v36 = vsub.f32 %v4439_v24, %v1728_v48 }
 0xa0b   : > { %v1753_v26 = vmax.f32 %v3923_v51, 0.0  ;;  %4440 = vst [vmem:[#allocation46_spill] sm:$0xff] %v3938_v36  ;;  %v1779_v45 = vperm.slane %v3938_v36, 0  ;;  %vm2159_vm7 = vcmp.gt.f32.partialorder %v3923_v51, 0.0  ;;  %v4450_v51 = vld [vmem:[#allocation24_spill] sm:$0xff] }
 0xa0d   : > { %1773 = vmatmul.f32.vlgmr.msrb.gmra.mxu3 %v1753_v26 }
 0xa90   : > { %v1774_v2 = vpop.f32.mrf.mxu3 }
 0xa91   : > { %v3932_v28 = vadd.f32 %v1774_v2, %v1755_v9 }
 0xa93   : > { %v1777_v59 = vmax.f32 %v3932_v28, 0.0  ;;  %vm1984_vm6 = vcmp.gt.f32.partialorder %v3932_v28, 0.0 }
 0xa95   : > { %1813 = vxpose.xlu2.b32.start.end [1/1] (short) %v1777_v59, 128  ;;  %1797 = vmatmul.f32.vlgmr.msrb.gmra.mxu0 %v1777_v59 }
 0xb12   : > { %v1798_v6 = vpop.f32.mrf.mxu0 }
 0xb13   : > { %v1799_v40 = vadd.f32 %v1798_v6, %v1779_v45 }
 0xb15   : > { %1988 = vxpose.xlu2.b32.start.end [1/1] (short) %v1753_v26, 128  ;;  %v1801_v22 = vadd.f32 %v1799_v40, %v4441_v16 }
 0xb17   : > { %1802 = vmax.xlane.f32.xlu1 %v1801_v22 }
 0xb2e   : > { %v1829_v19 = vpop.trf.xlu2 }
 0xb36   : > { %v1830_v46 = vpop.trf.xlu2 }
 0xb3e   : > { %v1831_v57 = vpop.trf.xlu2 }
 0xb46   : > { %v1832_v2 = vpop.trf.xlu2 }
 0xb4e   : > { %v1833_v50 = vpop.trf.xlu2 }
 0xb56   : > { %v1834_v41 = vpop.trf.xlu2 }
 0xb5e   : > { %v1835_v34 = vpop.trf.xlu2 }
 0xb66   : > { %v1836_v11 = vpop.trf.xlu2 }
 0xb6e   : > { %v1837_v10 = vpop.trf.xlu2 }
 0xb76   : > { %v1838_v26 = vpop.trf.xlu2 }
 0xb7e   : > { %v1839_v32 = vpop.trf.xlu2 }
 0xb86   : > { %v1840_v56 = vpop.trf.xlu2 }
 0xb8a   : > { %v1803_v7 = vpop.xlane.xlu1 %1802 }
 0xb8b   : > { %v1804_v35 = vsub.f32 %v1801_v22, %v1803_v7 }
 0xb8d   : > { %v1805_v9 = vmul.f32 1.442695, %v1804_v35 }
 0xb8e   : > { %v1841_v48 = vpop.trf.xlu2 }
 0xb8f   : > { %2696 = vpow2.f32 %v1805_v9  ;;  %v2701_v9 = vld [vmem:[%s3122_s21] sm:$0xff] }
 0xb95   : > { %v2697_v59 = vpop.eup %2696 }
 0xb96   : > { %1807 = vadd.xlane.f32.xlu0 %v2697_v59  ;;  %v1842_v24 = vpop.trf.xlu2 }
 0xb9e   : > { %v1843_v45 = vpop.trf.xlu2 }
 0xba6   : > { %v1844_v6 = vpop.trf.xlu2 }
 0xbae   : > { %v2004_v40 = vpop.trf.xlu2 }
 0xbb6   : > { %v2005_v7 = vpop.trf.xlu2 }
 0xbbe   : > { %v2006_v55 = vpop.trf.xlu2 }
 0xbc6   : > { %v2007_v0 = vpop.trf.xlu2 }
 0xc09   : > { %v1808_v16 = vpop.xlane.xlu0 %1807 }
 0xc0a   : > { %2698 = vrcp.f32 %v1808_v16  ;;  %v2008_v16 = vpop.trf.xlu2 }
 0xc10   : > { %v2699_v22 = vpop.eup %2698 }
 0xc11   : > { %v1810_v35 = vmul.f32 %v2699_v22, %v2697_v59 }
 0xc12   : > { %v2009_v59 = vpop.trf.xlu2 }
 0xc13   : > { %v1811_v36 = vsub.f32 %v1810_v35, %v2701_v9  ;;  %v4453_v35 = vld [vmem:[#allocation28_spill] sm:$0xff]  ;;  %v4454_v9 = vld [vmem:[#allocation29_spill] sm:$0xff] }
 0xc15   : > { %v3943_v21 = vmul.f32 0.125, %v1811_v36 }
 0xc17   : > { %4442 = vst [vmem:[#allocation47_spill] sm:$0xff] %v3943_v21  ;;  %1908 = vmatpush.msra.mxu3 %v3943_v21  ;;  %1980 = vmatmul.f32.vlgmr.msrb.gmra.mxu2 %v3943_v21 }
 0xc18   : > { %2608 = vmatmul.msk.f32.vlgmr.msra.gmra.mxu3 %vm552_vm2, %v1829_v19 }
 0xc1a   : > { %v2010_v36 = vpop.trf.xlu2 }
 0xc20   : > { %2609 = vmatmul.msk.f32.gmra.mxu3 %vm552_vm2, %v1830_v46 }
 0xc22   : > { %v2011_v22 = vpop.trf.xlu2 }
 0xc28   : > { %2610 = vmatmul.msk.f32.gmra.mxu3 %vm552_vm2, %v1831_v57 }
 0xc2a   : > { %v2012_v19 = vpop.trf.xlu2 }
 0xc30   : > { %2611 = vmatmul.msk.f32.gmra.mxu3 %vm552_vm2, %v1832_v2 }
 0xc32   : > { %v2013_v46 = vpop.trf.xlu2 }
 0xc38   : > { %2612 = vmatmul.msk.f32.gmra.mxu3 %vm552_vm2, %v1833_v50 }
 0xc3a   : > { %v2014_v57 = vpop.trf.xlu2 }
 0xc40   : > { %2613 = vmatmul.msk.f32.gmra.mxu3 %vm552_vm2, %v1834_v41 }
 0xc42   : > { %v2015_v2 = vpop.trf.xlu2 }
 0xc48   : > { %2614 = vmatmul.msk.f32.gmra.mxu3 %vm552_vm2, %v1835_v34 }
 0xc4a   : > { %v2016_v50 = vpop.trf.xlu2 }
 0xc50   : > { %2615 = vmatmul.msk.f32.gmra.mxu3 %vm552_vm2, %v1836_v11 }
 0xc52   : > { %v2017_v41 = vpop.trf.xlu2 }
 0xc58   : > { %2616 = vmatmul.msk.f32.gmra.mxu3 %vm552_vm2, %v1837_v10  ;;  %v4443_v10 = vmov 0.0  }
 0xc5a   : > { %v2018_v34 = vpop.trf.xlu2 }
 0xc60   : > { %2617 = vmatmul.msk.f32.gmra.mxu3 %vm552_vm2, %v1838_v26  ;;  %v2624_v26 = vsel %vm1984_vm6, 1.0, %v4443_v10 }
 0xc68   : > { %2618 = vmatmul.msk.f32.gmra.mxu3 %vm552_vm2, %v1839_v32 }
 0xc70   : > { %2619 = vmatmul.msk.f32.gmra.mxu3 %vm552_vm2, %v1840_v56  ;;  %v2019_v56 = vpop.trf.xlu2 }
 0xc78   : > { %2620 = vmatmul.msk.f32.gmra.mxu3 %vm552_vm2, %v1841_v48  ;;  %v4446_v48 = vld [vmem:[#allocation19_spill] sm:$0xff] }
 0xc80   : > { %2621 = vmatmul.msk.f32.gmra.mxu3 %vm552_vm2, %v1842_v24  ;;  %v4447_v24 = vld [vmem:[#allocation20_spill] sm:$0xff] }
 0xc88   : > { %2622 = vmatmul.msk.f32.gmra.mxu3 %vm552_vm2, %v1843_v45  ;;  %v4448_v45 = vld [vmem:[#allocation21_spill] sm:$0xff] }
 0xc90   : > { %2623 = vmatmul.msk.f32.gmra.mxu3 %vm552_vm2, %v1844_v6  ;;  %v4449_v6 = vld [vmem:[#allocation22_spill] sm:$0xff] }
 0xc9a   : > { %v1981_v11 = vpop.f32.mrf.mxu2 }
 0xc9b   : > { %v3965_v32 = vmul.f32 %v2624_v26, %v1981_v11 }
 0xc9d   : > { %4444 = vst [vmem:[#allocation48_spill] sm:$0xff] %v3965_v32  ;;  %2083 = vmatpush.msra.mxu0 %v3965_v32  ;;  %2661 = vmatpush.msrb.mxu3 %v3965_v32 }
 0xc9e   : > { %2155 = vmatmul.f32.vlgmr.msrb.gmra.mxu1 %v3965_v32  ;;  %2625 = vmatmul.msk.f32.vlgmr.msra.gmra.mxu0 %vm552_vm2, %v2004_v40  ;;  %v4451_v40 = vld [vmem:[#allocation26_spill] sm:$0xff] }
 0xc9f   : > { %2640 = vmatmul.msk.f32.vlgmr.msrb.gmra.mxu3 %vm552_vm2, %v2019_v56 }
 0xca6   : > { %2626 = vmatmul.msk.f32.gmra.mxu0 %vm552_vm2, %v2005_v7  ;;  %v4452_v7 = vld [vmem:[#allocation27_spill] sm:$0xff] }
 0xcae   : > { %2627 = vmatmul.msk.f32.gmra.mxu0 %vm552_vm2, %v2006_v55  ;;  %v2641_v55 = vsel %vm2159_vm7, 1.0, %v4443_v10 }
 0xcb6   : > { %2628 = vmatmul.msk.f32.gmra.mxu0 %vm552_vm2, %v2007_v0 }
 0xcbe   : > { %2629 = vmatmul.msk.f32.gmra.mxu0 %vm552_vm2, %v2008_v16  ;;  %v4455_v16 = vld [vmem:[#allocation30_spill] sm:$0xff] }
 0xcc6   : > { %2630 = vmatmul.msk.f32.gmra.mxu0 %vm552_vm2, %v2009_v59  ;;  %v4456_v59 = vld [vmem:[#allocation31_spill] sm:$0xff] }
 0xcce   : > { %2631 = vmatmul.msk.f32.gmra.mxu0 %vm552_vm2, %v2010_v36  ;;  %v4457_v36 = vld [vmem:[#allocation32_spill] sm:$0xff] }
 0xcd6   : > { %2632 = vmatmul.msk.f32.gmra.mxu0 %vm552_vm2, %v2011_v22  ;;  %v4458_v22 = vld [vmem:[#allocation33_spill] sm:$0xff] }
 0xcde   : > { %2633 = vmatmul.msk.f32.gmra.mxu0 %vm552_vm2, %v2012_v19  ;;  %v4021_v19 = vpop.f32.mrf.mxu3 }
 0xcdf   : > { %4459 = vst [vmem:[#allocation10_spill] sm:$0xff] %v4021_v19 }
 0xce6   : > { %2634 = vmatmul.msk.f32.gmra.mxu0 %vm552_vm2, %v2013_v46  ;;  %v4025_v46 = vpop.f32.mrf.mxu3 }
 0xce7   : > { %4460 = vst [vmem:[#allocation5_spill] sm:$0xff] %v4025_v46 }
 0xcee   : > { %2635 = vmatmul.msk.f32.gmra.mxu0 %vm552_vm2, %v2014_v57 }
 0xcf6   : > { %2636 = vmatmul.msk.f32.gmra.mxu0 %vm552_vm2, %v2015_v2 }
 0xcfe   : > { %2637 = vmatmul.msk.f32.gmra.mxu0 %vm552_vm2, %v2016_v50  ;;  %v4031_v50 = vpop.f32.mrf.mxu3 }
 0xcff   : > { %4461 = vst [vmem:[#allocation9_spill] sm:$0xff] %v4031_v50 }
 0xd06   : > { %2638 = vmatmul.msk.f32.gmra.mxu0 %vm552_vm2, %v2017_v41 }
 0xd0e   : > { %2639 = vmatmul.msk.f32.gmra.mxu0 %vm552_vm2, %v2018_v34 }
 0xd1b   : > { %v2156_v0 = vpop.f32.mrf.mxu1  ;;  %v4033_v41 = vpop.f32.mrf.mxu0 }
 0xd1c   : > { %v3988_v28 = vmul.f32 %v2641_v55, %v2156_v0 }
 0xd1e   : > { %4445 = vst [vmem:[#allocation49_spill] sm:$0xff] %v3988_v28  ;;  %2178 = vmatpush.msra.mxu2 %v3988_v28 }
 0xd1f   : > { %2642 = vmatmul.msk.f32.vlgmr.msra.gmra.mxu2 %vm552_vm2, %v4446_v48 }
 0xd27   : > { %2643 = vmatmul.msk.f32.gmra.mxu2 %vm552_vm2, %v4447_v24 }
 0xd2f   : > { %2644 = vmatmul.msk.f32.gmra.mxu2 %vm552_vm2, %v4448_v45 }
 0xd37   : > { %2645 = vmatmul.msk.f32.gmra.mxu2 %vm552_vm2, %v4449_v6 }
 0xd3f   : > { %2646 = vmatmul.msk.f32.gmra.mxu2 %vm552_vm2, %v4450_v51 }
 0xd47   : > { %2647 = vmatmul.msk.f32.gmra.mxu2 %vm552_vm2, %v4451_v40 }
 0xd4f   : > { %2648 = vmatmul.msk.f32.gmra.mxu2 %vm552_vm2, %v4452_v7 }
 0xd57   : > { %2649 = vmatmul.msk.f32.gmra.mxu2 %vm552_vm2, %v4453_v35 }
 0xd5f   : > { %2650 = vmatmul.msk.f32.gmra.mxu2 %vm552_vm2, %v4454_v9 }
 0xd67   : > { %2651 = vmatmul.msk.f32.gmra.mxu2 %vm552_vm2, %v4455_v16 }
 0xd6f   : > { %2652 = vmatmul.msk.f32.gmra.mxu2 %vm552_vm2, %v4456_v59 }
 0xd77   : > { %2653 = vmatmul.msk.f32.gmra.mxu2 %vm552_vm2, %v4457_v36 }
 0xd7f   : > { %2654 = vmatmul.msk.f32.gmra.mxu2 %vm552_vm2, %v4458_v22 }
 0xd87   : > { %2655 = vmatmul.msk.f32.gmra.mxu2 %vm552_vm2, %v4388_v39  ;;  %v4037_v39 = vpop.f32.mrf.mxu3 }
 0xd88   : > { %4462 = vst [vmem:[#allocation6_spill] sm:$0xff] %v4037_v39 }
 0xd8f   : > { %2656 = vmatmul.msk.f32.gmra.mxu2 %vm552_vm2, %v3152_v60  ;;  %v4039_v60 = vpop.f32.mrf.mxu0  ;;  %v4043_v10 = vpop.f32.mrf.mxu3 }
 0xd90   : > { %4463 = vst [vmem:[#allocation8_spill] sm:$0xff] %v4043_v10 }
 0xd97   : > { %2657 = vmatmul.msk.f32.gmra.mxu2 %vm552_vm2, %v3154_v49  ;;  %v4045_v49 = vpop.f32.mrf.mxu0  ;;  %v4047_v56 = vpop.f32.mrf.mxu3 }
 0xd98   : > { %4464 = vst [vmem:[#allocation7_spill] sm:$0xff] %v4047_v56 }
 0xd9f   : > { %v4049_v0 = vpop.f32.mrf.mxu0  ;;  %v4051_v24 = vpop.f32.mrf.mxu3 }
 0xda0   : > { %4465 = vst [vmem:[#allocation18_spill] sm:$0xff] %v4051_v24 }
 0xda2   : > { %v4027_v57 = vpop.f32.mrf.mxu2 }
 0xda7   : > { %v4053_v45 = vpop.f32.mrf.mxu0  ;;  %v4055_v51 = vpop.f32.mrf.mxu3 }
 0xda8   : > { %4466 = vst [vmem:[#allocation19_spill] sm:$0xff] %v4055_v51 }
 0xdaa   : > { %v4029_v2 = vpop.f32.mrf.mxu2 }
 0xdaf   : > { %v4057_v40 = vpop.f32.mrf.mxu0  ;;  %v4059_v35 = vpop.f32.mrf.mxu3 }
 0xdb0   : > { %4467 = vst [vmem:[#allocation20_spill] sm:$0xff] %v4059_v35 }
 0xdb2   : > { %v4035_v34 = vpop.f32.mrf.mxu2 }
 0xdb7   : > { %v4061_v9 = vpop.f32.mrf.mxu0  ;;  %v4063_v59 = vpop.f32.mrf.mxu3 }
 0xdb8   : > { %4468 = vst [vmem:[#allocation21_spill] sm:$0xff] %v4063_v59 }
 0xdba   : > { %v4041_v11 = vpop.f32.mrf.mxu2 }
 0xdbf   : > { %v4065_v36 = vpop.f32.mrf.mxu0  ;;  %v4067_v32 = vpop.f32.mrf.mxu3 }
 0xdc2   : > { %v2192_v26 = vpop.f32.mrf.mxu2 }
 0xdc7   : > { %v4069_v28 = vpop.f32.mrf.mxu0  ;;  %v4071_v44 = vpop.f32.mrf.mxu3 }
 0xdca   : > { %v2195_v55 = vpop.f32.mrf.mxu2 }
 0xdcf   : > { %v4073_v19 = vpop.f32.mrf.mxu0  ;;  %v4075_v46 = vpop.f32.mrf.mxu3 }
 0xdd2   : > { %v2198_v48 = vpop.f32.mrf.mxu2 }
 0xdd7   : > { %v4077_v53 = vpop.f32.mrf.mxu0  ;;  %v4079_v47 = vpop.f32.mrf.mxu3 }
 0xdda   : > { %v2201_v6 = vpop.f32.mrf.mxu2 }
 0xddf   : > { %v4081_v39 = vpop.f32.mrf.mxu0  ;;  %v4087_v59 = vpop.f32.mrf.mxu3 }
 0xde2   : > { %v2204_v7 = vpop.f32.mrf.mxu2 }
 0xde7   : > { %v2121_v25 = vpop.f32.mrf.mxu0 }
 0xdea   : > { %v2207_v16 = vpop.f32.mrf.mxu2 }
 0xdf2   : > { %v2210_v22 = vpop.f32.mrf.mxu2 }
 0xdf3   : > { %v2244_v35 = vmul.f32 0.01, %v2210_v22 }
 0xdfa   : > { %v2213_v21 = vpop.f32.mrf.mxu2 }
 0xdfb   : > { %v2245_v51 = vmul.f32 0.01, %v2213_v21 }
 0xe02   : > { %v2216_v62 = vpop.f32.mrf.mxu2 }
 0xe03   : > { %v2246_v24 = vmul.f32 0.01, %v2216_v62 }
 0xe05   : > { %v2262_v29 = vsub.f32 %v3828_v4, %v2246_v24  ;;  %v4094_v4 = vpop.f32.mrf.mxu3 }
 0xe0a   : > { %v2219_v12 = vpop.f32.mrf.mxu2 }
 0xe0b   : > { %v2247_v56 = vmul.f32 0.01, %v2219_v12 }
 0xe0d   : > { %v2263_v8 = vsub.f32 %v3820_v18, %v2247_v56 }
 0xe12   : > { %v2222_v50 = vpop.f32.mrf.mxu2 }
 0xe13   : > { %v2248_v10 = vmul.f32 0.01, %v2222_v50  ;;  %v2243_v50 = vmul.f32 0.01, %v2207_v16  ;;  %v2277_v16 = vmul.f32 0.01, %v4073_v19 }
 0xe14   : > { %v2273_v19 = vmul.f32 0.01, %v4057_v40  ;;  %v2269_v40 = vmul.f32 0.01, %v4039_v60  ;;  %v2315_v60 = vmul.f32 0.01, %v4079_v47 }
 0xe15   : > { %v2264_v61 = vsub.f32 %v3815_v30, %v2248_v10  ;;  %v2259_v12 = vsub.f32 %v3849_v1, %v2243_v50  ;;  %v4473_v50 = vld [vmem:[#allocation15_spill] sm:$0xff] }
 0xe1a   : > { %v2225_v52 = vpop.f32.mrf.mxu2 }
 0xe1b   : > { %v2249_v20 = vmul.f32 0.01, %v2225_v52  ;;  %v2261_v52 = vsub.f32 %v3834_v14, %v2245_v51  ;;  %v2124_v14 = vpop.f32.mrf.mxu0  ;;  %v4470_v51 = vld [vmem:[#allocation12_spill] sm:$0xff] }
 0xe1d   : > { %v2265_v3 = vsub.f32 %v3808_v15, %v2249_v20  ;;  %v2242_v20 = vmul.f32 0.01, %v2204_v7  ;;  %v2260_v15 = vsub.f32 %v3843_v38, %v2244_v35  ;;  %v2237_v38 = vmul.f32 0.01, %v4041_v11  ;;  %v4471_v35 = vld [vmem:[#allocation13_spill] sm:$0xff] }
 0xe1f   : > { %2339 = vmatpush.msra.mxu1 %v2265_v3  ;;  %v2241_v3 = vmul.f32 0.01, %v2201_v6  ;;  %v2258_v30 = vsub.f32 %v3857_v17, %v2242_v20  ;;  %v2236_v17 = vmul.f32 0.01, %v4035_v34  ;;  %v2253_v10 = vsub.f32 %v3883_v5, %v2237_v38  ;;  %v381_v5 = vld [vmem:[%s374_s10] sm:$0xff] }
 0xe20   : > { %v2279_v6 = vmul.f32 0.01, %v4081_v39  ;;  %v2275_v39 = vmul.f32 0.01, %v4065_v36  ;;  %v4474_v20 = vld [vmem:[#allocation17_spill] sm:$0xff] }
 0xe21   : > { %2340 = vmatpush.msra.mxu1 %v2264_v61  ;;  %v2240_v61 = vmul.f32 0.01, %v2198_v48  ;;  %v2257_v18 = vsub.f32 %v3863_v37, %v2241_v3  ;;  %v2235_v37 = vmul.f32 0.01, %v4029_v2  ;;  %v2252_v56 = vsub.f32 %v3888_v43, %v2236_v17  ;;  %v4469_v48 = vld [vmem:[#allocation11_spill] sm:$0xff]  ;;  %v4475_v3 = vld [vmem:[#allocation16_spill] sm:$0xff] }
 0xe22   : > { %v2280_v43 = vmul.f32 0.01, %v2121_v25  ;;  %v2276_v25 = vmul.f32 0.01, %v4069_v28  ;;  %v2272_v28 = vmul.f32 0.01, %v4053_v45 }
 0xe23   : > { %2341 = vmatpush.msra.mxu1 %v2263_v8  ;;  %v2239_v8 = vmul.f32 0.01, %v2195_v55  ;;  %v2256_v62 = vsub.f32 %v3868_v33, %v2240_v61  ;;  %v2234_v33 = vmul.f32 0.01, %v4027_v57  ;;  %v2127_v11 = vpop.f32.mrf.mxu0  ;;  %v2281_v57 = vmul.f32 0.01, %v2124_v14 }
 0xe24   : > { %v2282_v34 = vmul.f32 0.01, %v2127_v11  ;;  %v4476_v61 = vld [vmem:[#allocation25_spill] sm:$0xff]  ;;  %v2271_v36 = vmul.f32 0.01, %v4049_v0  ;;  %v4478_v14 = vld [vmem:[#allocation34_spill] sm:$0xff] }
 0xe25   : > { %2342 = vmatpush.msra.mxu1 %v2262_v29  ;;  %v2238_v29 = vmul.f32 0.01, %v2192_v26  ;;  %v2255_v1 = vsub.f32 %v3873_v27, %v2239_v8  ;;  %v2130_v26 = vpop.f32.mrf.mxu3  ;;  %v2250_v2 = vsub.f32 %v3896_v23, %v2234_v33  ;;  %v2297_v7 = vsub.f32 %v4470_v51, %v2281_v57  ;;  %v4477_v8 = vld [vmem:[#allocation23_spill] sm:$0xff]  ;;  %v4487_v57 = vld [vmem:[#allocation20_spill] sm:$0xff]  ;;  %v4492_v51 = vld [vmem:[#allocation50_spill] sm:$0xff] }
 0xe26   : > { %v2283_v27 = vmul.f32 0.01, %v2130_v26  ;;  %v2298_v24 = vsub.f32 %v4469_v48, %v2282_v34  ;;  %v2296_v23 = vsub.f32 %v4471_v35, %v2280_v43  ;;  %v2268_v45 = vmul.f32 0.01, %v4033_v41  ;;  %v4483_v33 = vld [vmem:[#allocation39_spill] sm:$0xff]  ;;  %v4484_v34 = vld [vmem:[#allocation40_spill] sm:$0xff] }
 0xe27   : > { %2343 = vmatpush.msra.mxu1 %v2261_v52  ;;  %v2254_v21 = vsub.f32 %v3878_v42, %v2238_v29  ;;  %v2251_v42 = vsub.f32 %v3892_v63, %v2235_v37  ;;  %v2278_v63 = vmul.f32 0.01, %v4077_v53  ;;  %v2274_v53 = vmul.f32 0.01, %v4061_v9  ;;  %v4488_v43 = vld [vmem:[#allocation43_spill] sm:$0xff] }
 0xe28   : > { %v2299_v55 = vsub.f32 %v3642_v31, %v2283_v27  ;;  %v4472_v31 = vld [vmem:[#allocation14_spill] sm:$0xff]  ;;  %v2289_v29 = vsub.f32 %v4478_v14, %v2273_v19  ;;  %v2270_v9 = vmul.f32 0.01, %v4045_v49  ;;  %v2317_v0 = vmul.f32 0.01, %v4094_v4  ;;  %v4489_v48 = vld [vmem:[#allocation19_spill] sm:$0xff] }
 0xe29   : > { %2344 = vmatpush.msra.mxu1 %v2260_v15  ;;  %v2295_v22 = vsub.f32 %v4472_v31, %v2279_v6  ;;  %v2294_v52 = vsub.f32 %v4473_v50, %v2278_v63  ;;  %v2293_v15 = vsub.f32 %v4474_v20, %v2277_v16  ;;  %v2316_v49 = vmul.f32 0.01, %v4087_v59  ;;  %v4491_v6 = vld [vmem:[#allocation18_spill] sm:$0xff]  ;;  %v4493_v63 = vld [vmem:[#allocation7_spill] sm:$0xff]  ;;  %v4495_v31 = vld [vmem:[#allocation8_spill] sm:$0xff] }
 0xe2a   : > { %v2333_v11 = vsub.f32 %v3755_v58, %v2317_v0  ;;  %v2314_v41 = vmul.f32 0.01, %v4075_v46  ;;  %v2313_v4 = vmul.f32 0.01, %v4071_v44  ;;  %v2312_v59 = vmul.f32 0.01, %v4067_v32 }
 0xe2b   : > { %2345 = vmatpush.msra.mxu1 %v2259_v12  ;;  %v2292_v12 = vsub.f32 %v4475_v3, %v2276_v25  ;;  %v2332_v27 = vsub.f32 %v3759_v54, %v2316_v49  ;;  %v2310_v46 = vmul.f32 0.01, %v4487_v57  ;;  %v2309_v44 = vmul.f32 0.01, %v4489_v48  ;;  %v4496_v25 = vld [vmem:[#allocation52_spill] sm:$0xff]  ;;  %v4498_v20 = vld [vmem:[#allocation53_spill] sm:$0xff] }
 0xe2c   : > { %v2328_v54 = vsub.f32 %v4488_v43, %v2312_v59  ;;  %v2308_v32 = vmul.f32 0.01, %v4491_v6  ;;  %v2307_v35 = vmul.f32 0.01, %v4493_v63  ;;  %v4504_v14 = vld [vmem:[#allocation56_spill] sm:$0xff]  ;;  %v4511_v48 = vld [vmem:[#allocation47_spill] sm:$0xff] }
 0xe2d   : > { %2346 = vmatpush.msra.mxu1 %v2258_v30  ;;  %v2291_v30 = vsub.f32 %v4476_v61, %v2275_v39  ;;  %v4501_v61 = vld [vmem:[#allocation5_spill] sm:$0xff]  ;;  %v4508_v49 = vld [vmem:[#allocation44_spill] sm:$0xff]  ;;  %v4512_v63 = vld [vmem:[#allocation46_spill] sm:$0xff] }
 0xe2e   : > { %v2324_v50 = vsub.f32 %v4496_v25, %v2308_v32 }
 0xe2f   : > { %2347 = vmatpush.msra.mxu1 %v2257_v18  ;;  %v2290_v18 = vsub.f32 %v4477_v8, %v2274_v53  ;;  %v4499_v53 = vld [vmem:[#allocation9_spill] sm:$0xff] }
 0xe30   : > { %v2304_v3 = vmul.f32 0.01, %v4499_v53 }
 0xe31   : > { %2348 = vmatpush.msra.mxu1 %v2256_v62  ;;  %v4479_v62 = vld [vmem:[#allocation35_spill] sm:$0xff] }
 0xe32   : > { %v2288_v38 = vsub.f32 %v4479_v62, %v2272_v28  ;;  %v4502_v28 = vld [vmem:[#allocation55_spill] sm:$0xff] }
 0xe33   : > { %2349 = vmatpush.msra.mxu1 %v2255_v1  ;;  %v4480_v1 = vld [vmem:[#allocation36_spill] sm:$0xff] }
 0xe34   : > { %v2287_v17 = vsub.f32 %v4480_v1, %v2271_v36  ;;  %v4507_v1 = vld [vmem:[#allocation49_spill] sm:$0xff] }
 0xe35   : > { %2350 = vmatpush.msra.mxu1 %v2254_v21  ;;  %v4481_v21 = vld [vmem:[#allocation37_spill] sm:$0xff] }
 0xe36   : > { %v2286_v37 = vsub.f32 %v4481_v21, %v2270_v9  ;;  %v4505_v9 = vld [vmem:[#allocation57_spill] sm:$0xff] }
 0xe37   : > { %2351 = vmatpush.msra.mxu1 %v2253_v10  ;;  %v4482_v10 = vld [vmem:[#allocation38_spill] sm:$0xff] }
 0xe38   : > { %v2285_v26 = vsub.f32 %v4482_v10, %v2269_v40 }
 0xe39   : > { %2352 = vmatpush.msra.mxu1 %v2252_v56  ;;  %v2284_v56 = vsub.f32 %v4483_v33, %v2268_v45 }
 0xe3b   : > { %2353 = vmatpush.msra.mxu1 %v2251_v42  ;;  %v2331_v42 = vsub.f32 %v3763_v13, %v2315_v60 }
 0xe3d   : > { %2354 = vmatpush.msra.mxu1 %v2250_v2  ;;  %v2330_v2 = vsub.f32 %v4484_v34, %v2314_v41 }
 0xe3e   : > { %2355 = vmatmul.f32.vlgmr.msra.gmra.mxu1 %v381_v5  ;;  %v4485_v5 = vld [vmem:[#allocation21_spill] sm:$0xff] }
 0xe3f   : > { %2363 = vmatpush.msrb.mxu1 %v2299_v55  ;;  %v2311_v47 = vmul.f32 0.01, %v4485_v5  ;;  %v4486_v55 = vld [vmem:[#allocation41_spill] sm:$0xff] }
 0xe40   : > { %v2329_v58 = vsub.f32 %v4486_v55, %v2313_v4  ;;  %v4510_v55 = vld [vmem:[#allocation45_spill] sm:$0xff] }
 0xe41   : > { %2364 = vmatpush.msrb.mxu1 %v2298_v24  ;;  %v4490_v24 = vld [vmem:[#allocation42_spill] sm:$0xff] }
 0xe42   : > { %v2327_v13 = vsub.f32 %v4490_v24, %v2311_v47 }
 0xe43   : > { %2365 = vmatpush.msrb.mxu1 %v2297_v7  ;;  %v2326_v7 = vsub.f32 %v4492_v51, %v2310_v46 }
 0xe45   : > { %2366 = vmatpush.msrb.mxu1 %v2296_v23  ;;  %v4494_v23 = vld [vmem:[#allocation51_spill] sm:$0xff] }
 0xe46   : > { %v2325_v16 = vsub.f32 %v4494_v23, %v2309_v44  ;;  %v1958_v44 = vrot.slane %v4511_v48, 4 }
 0xe47   : > { %2367 = vmatpush.msrb.mxu1 %v2295_v22  ;;  %v2306_v22 = vmul.f32 0.01, %v4495_v31 }
 0xe48   : > { %v1959_v24 = vadd.f32 %v1958_v44, %v4511_v48 }
 0xe49   : > { %2368 = vmatpush.msrb.mxu1 %v2294_v52  ;;  %v4497_v52 = vld [vmem:[#allocation6_spill] sm:$0xff] }
 0xe4a   : > { %v2305_v39 = vmul.f32 0.01, %v4497_v52 }
 0xe4b   : > { %2369 = vmatpush.msrb.mxu1 %v2293_v15  ;;  %v2323_v15 = vsub.f32 %v4498_v20, %v2307_v35 }
 0xe4c   : > { %v2321_v8 = vsub.f32 %v4502_v28, %v2305_v39 }
 0xe4d   : > { %2370 = vmatpush.msrb.mxu1 %v2292_v12  ;;  %v4500_v12 = vld [vmem:[#allocation54_spill] sm:$0xff] }
 0xe4e   : > { %v2322_v19 = vsub.f32 %v4500_v12, %v2306_v22 }
 0xe4f   : > { %2371 = vmatpush.msrb.mxu1 %v2291_v30  ;;  %v2303_v30 = vmul.f32 0.01, %v4501_v61 }
 0xe51   : > { %2372 = vmatpush.msrb.mxu1 %v2290_v18  ;;  %v4503_v18 = vld [vmem:[#allocation10_spill] sm:$0xff]  ;;  %v2319_v62 = vsub.f32 %v4505_v9, %v2303_v30 }
 0xe52   : > { %v2302_v36 = vmul.f32 0.01, %v4503_v18 }
 0xe53   : > { %2373 = vmatpush.msrb.mxu1 %v2289_v29  ;;  %v2320_v29 = vsub.f32 %v4504_v14, %v2304_v3 }
 0xe55   : > { %2374 = vmatpush.msrb.mxu1 %v2288_v38  ;;  %v4506_v38 = vld [vmem:[#allocation58_spill] sm:$0xff] }
 0xe56   : > { %v2318_v40 = vsub.f32 %v4506_v38, %v2302_v36 }
 0xe57   : > { %2375 = vmatpush.msrb.mxu1 %v2287_v17  ;;  %v2228_v17 = vrot.slane %v4507_v1, 4 }
 0xe59   : > { %2376 = vmatpush.msrb.mxu1 %v2286_v37  ;;  %v2229_v45 = vadd.f32 %v2228_v17, %v4507_v1 }
 0xe5b   : > { %2377 = vmatpush.msrb.mxu1 %v2285_v26  ;;  %v2230_v21 = vrot.slane %v2229_v45, 2 }
 0xe5d   : > { %2378 = vmatpush.msrb.mxu1 %v2284_v56  ;;  %v2231_v37 = vadd.f32 %v2230_v21, %v2229_v45 }
 0xe5f   : > { %2387 = vmatpush.msra.mxu1 %v2333_v11  ;;  %v2232_v0 = vrot.slane %v2231_v37, 1 }
 0xe61   : > { %2388 = vmatpush.msra.mxu1 %v2332_v27  ;;  %v2233_v10 = vadd.f32 %v2232_v0, %v2231_v37  ;;  %v4509_v27 = vld [vmem:[#allocation48_spill] sm:$0xff] }
 0xe62   : > { %v2133_v4 = vrot.slane %v4509_v27, 4 }
 0xe63   : > { %2389 = vmatpush.msra.mxu1 %v2331_v42  ;;  %v2266_v26 = vmul.f32 0.01, %v2233_v10 }
 0xe64   : > { %v2134_v42 = vadd.f32 %v2133_v4, %v4509_v27 }
 0xe65   : > { %2390 = vmatpush.msra.mxu1 %v2330_v2  ;;  %v2267_v33 = vsub.f32 %v4508_v49, %v2266_v26 }
 0xe66   : > { %v2135_v59 = vrot.slane %v2134_v42, 2 }
 0xe67   : > { %2391 = vmatpush.msra.mxu1 %v2329_v58  ;;  %v2337_v56 = vperm.slane %v2267_v33, 0 }
 0xe68   : > { %v2136_v34 = vadd.f32 %v2135_v59, %v2134_v42 }
 0xe69   : > { %2392 = vmatpush.msra.mxu1 %v2328_v54 }
 0xe6a   : > { %v2137_v2 = vrot.slane %v2136_v34, 1 }
 0xe6b   : > { %2393 = vmatpush.msra.mxu1 %v2327_v13  ;;  %v1960_v13 = vrot.slane %v1959_v24, 2 }
 0xe6c   : > { %v2138_v5 = vadd.f32 %v2137_v2, %v2136_v34 }
 0xe6d   : > { %2394 = vmatpush.msra.mxu1 %v2326_v7  ;;  %v1961_v6 = vadd.f32 %v1960_v13, %v1959_v24 }
 0xe6e   : > { %v2300_v47 = vmul.f32 0.01, %v2138_v5 }
 0xe6f   : > { %2395 = vmatpush.msra.mxu1 %v2325_v16  ;;  %v1962_v32 = vrot.slane %v1961_v6, 1 }
 0xe70   : > { %v2301_v58 = vsub.f32 %v4510_v55, %v2300_v47 }
 0xe71   : > { %2396 = vmatpush.msra.mxu1 %v2324_v50  ;;  %v1963_v51 = vadd.f32 %v1962_v32, %v1961_v6 }
 0xe72   : > { %v2361_v57 = vperm.slane %v2301_v58, 0 }
 0xe73   : > { %2397 = vmatpush.msra.mxu1 %v2323_v15  ;;  %v2334_v7 = vmul.f32 0.01, %v1963_v51 }
 0xe75   : > { %2398 = vmatpush.msra.mxu1 %v2322_v19  ;;  %v2335_v35 = vsub.f32 %v4512_v63, %v2334_v7 }
 0xe77   : > { %2399 = vmatpush.msra.mxu1 %v2321_v8  ;;  %v2385_v23 = vperm.slane %v2335_v35, 0 }
 0xe79   : > { %2400 = vmatpush.msra.mxu1 %v2320_v29 }
 0xe7b   : > { %2401 = vmatpush.msra.mxu1 %v2319_v62 }
 0xe7d   : > { %2402 = vmatpush.msra.mxu1 %v2318_v40 }
 0xebb   : > { %v2356_v60 = vpop.f32.mrf.mxu1 }
 0xebc   : > { %v2357_v11 = vadd.f32 %v2356_v60, %v2337_v56 }
 0xebe   : > { %v2359_v41 = vmax.f32 %v2357_v11, 0.0 }
 0xec0   : > { %2379 = vmatmul.f32.vlgmr.msrb.gmra.mxu1 %v2359_v41 }
 0xf3d   : > { %v2380_v46 = vpop.f32.mrf.mxu1 }
 0xf3e   : > { %v2381_v43 = vadd.f32 %v2380_v46, %v2361_v57 }
 0xf40   : > { %v2383_v54 = vmax.f32 %v2381_v43, 0.0 }
 0xf42   : > { %2403 = vmatmul.f32.vlgmr.msra.gmra.mxu1 %v2383_v54 }
 0xfbf   : > { %v2404_v16 = vpop.f32.mrf.mxu1 }
 0xfc0   : > { %v2405_v31 = vadd.f32 %v2404_v16, %v2385_v23 }
 0xfc2   : > { %2407 = vst [vmem:[%s378_s13] sm:$0xff] %v2405_v31 }
 0xfc3 PF: > { %s20_s30 = sadd.s32 1, %s2742_s30  }
 0xfc4   : > { %p17_p7 = scmp.ge.s32.totalorder %s20_s30, 7  }
 0xfc6   :  { %19 = sbr.rel (!%p17_p7) target bundleno = 1 (0x1), region = 97 }
 0xfcb   :  { %2427 = vsyncpa [#allocation3], 1 }
 0xfcc   :  { %2429 = vsyncpa [#allocation3 + $0x1], 1 }

</bundles_post_ra>
